<compile_context>
chip_gen: v5e
topology: v5e:2x2
jax: 0.10.0
libtpu: 0.0.40
codegen_flags: <defaults>
</compile_context>

<pallas_src>
import math
from functools import partial

import jax
import jax.numpy as jnp
from jax.experimental import pallas as pl
from jax.experimental.pallas import tpu as pltpu  # noqa: F401  (TPU backend)


def _erf(z):
    # Abramowitz & Stegun 7.1.26 polynomial approximation (|err| ~ 1.5e-7).
    a1, a2, a3, a4, a5 = (0.254829592, -0.284496736, 1.421413741,
                          -1.453152027, 1.061405429)
    p = 0.3275911
    za = jnp.abs(z)
    t = 1.0 / (1.0 + p * za)          # exact division (correctness feedback)
    poly = ((((a5 * t + a4) * t + a3) * t + a2) * t + a1) * t
    y = 1.0 - poly * jnp.exp(-za * za)
    return jnp.where(z >= 0, y, -y)


def _gelu_exact(u):
    return 0.5 * u * (1.0 + _erf(u * (1.0 / math.sqrt(2.0))))


def _layer_norm(v, gamma, beta, eps=1e-5):
    mu = jnp.mean(v, axis=-1, keepdims=True)
    var = jnp.mean((v - mu) ** 2, axis=-1, keepdims=True)
    return (v - mu) * jax.lax.rsqrt(var + eps) * gamma + beta


def _encoder_kernel(nlayers, nhead,
                    mask_ref, x_ref,
                    wqkv_ref, bqkv_ref, wo_ref, bo_ref,
                    w1_ref, b1_ref, w2_ref, b2_ref,
                    g1_ref, be1_ref, g2_ref, be2_ref,
                    out_ref):
    """All encoder layers, whole batch fused: x is (N, D) with N = S*B."""
    x = x_ref[...].astype(jnp.float32)          # (N, D)
    mask = mask_ref[...].astype(jnp.float32)    # (N, N) additive (incl. batch-block mask)
    N, D = x.shape
    hd = D // nhead
    scale = 1.0 / math.sqrt(hd)

    for l in range(nlayers):                    # static unroll over layers
        # ---- self-attention ----
        # single wide QKV projection: (N, D) @ (D, 3D) -> (N, 3D)
        qkv = jnp.dot(x, wqkv_ref[l],
                      preferred_element_type=jnp.float32) + bqkv_ref[l]

        o_heads = []
        for h in range(nhead):                  # static unroll over heads
            q_h = qkv[:, h * hd:(h + 1) * hd]               # (N, hd) lane slice
            k_h = qkv[:, D + h * hd:D + (h + 1) * hd]
            v_h = qkv[:, 2 * D + h * hd:2 * D + (h + 1) * hd]

            s = jnp.einsum('nd,md->nm', q_h, k_h,
                           preferred_element_type=jnp.float32) * scale
            s = s + mask                        # forbids cross-batch attention (+ user mask)
            s = s - jnp.max(s, axis=-1, keepdims=True)
            p = jnp.exp(s)
            p = p / jnp.sum(p, axis=-1, keepdims=True)      # exact division
            o_heads.append(jnp.dot(p, v_h, preferred_element_type=jnp.float32))

        o = jnp.concatenate(o_heads, axis=-1)               # (N, D)
        # single K=D output projection
        attn = jnp.dot(o, wo_ref[l],
                       preferred_element_type=jnp.float32) + bo_ref[l]

        # dropout == identity (eval); post-norm residual 1
        x = _layer_norm(x + attn, g1_ref[l], be1_ref[l])

        # ---- feed-forward: linear2(gelu(linear1(x))) ----
        h1 = _gelu_exact(jnp.dot(x, w1_ref[l],
                                 preferred_element_type=jnp.float32) + b1_ref[l])
        ff = jnp.dot(h1, w2_ref[l], preferred_element_type=jnp.float32) + b2_ref[l]

        # post-norm residual 2
        x = _layer_norm(x + ff, g2_ref[l], be2_ref[l])

    out_ref[...] = x.astype(out_ref.dtype)


def state_encoder_forward(src, params, nhead, src_mask=None):
    """src: (S, B, d_model) like PyTorch (batch_first=False). Returns same shape."""
    S, B, D = src.shape
    assert D % nhead == 0, "d_model must be divisible by nhead"
    nlayers = params["wqkv"].shape[0]
    N = S * B

    # Free bitcast reshape: row n <-> (s = n // B, b = n % B).  No transposes.
    x2d = src.reshape(N, D)

    # Additive mask: block-diagonal over batch (rows with different b can't attend),
    # plus the user mask (additive float; boolean True==disallowed also supported).
    b_idx = jnp.arange(N) % B
    mask = jnp.where(b_idx[:, None] == b_idx[None, :], 0.0, -1e9).astype(jnp.float32)
    if src_mask is not None:
        m = src_mask
        if jnp.issubdtype(m.dtype, jnp.bool_):
            m = jnp.where(m, -1e9, 0.0)
        m = m.astype(jnp.float32)
        mask = mask + jnp.repeat(jnp.repeat(m, B, axis=0), B, axis=1)

    names = ("wqkv", "bqkv", "wo", "bo", "w1", "b1", "w2", "b2",
             "g1", "be1", "g2", "be2")
    operands = [mask, x2d] + [params[n] for n in names]

    # Gridless pallas_call: single kernel step, all operands resident in VMEM
    # as whole-array blocks (total < 100 KB -- far below any VMEM limit).
    out = pl.pallas_call(
        partial(_encoder_kernel, nlayers, nhead),
        out_shape=jax.ShapeDtypeStruct((N, D), src.dtype),
    )(*operands)
    return out.reshape(S, B, D)                 # free bitcast back to (S, B, D)


def init_params(key, d_model, nhead, d_hid, nlayers):
    """Deterministic synthetic weights, same math as nn.TransformerEncoderLayer,
    pre-transposed and stacked on a leading (nlayers, ...) axis."""
    s = 0.02
    names = ("wqkv", "bqkv", "wo", "bo", "w1", "b1", "w2", "b2",
             "g1", "be1", "g2", "be2")
    acc = {n: [] for n in names}
    for layer in range(nlayers):
        ks = jax.random.split(jax.random.fold_in(key, layer), 8)
        w_in = jax.random.normal(ks[0], (3 * d_model, d_model), jnp.float32) * s  # in_proj_weight
        b_in = jax.random.normal(ks[1], (3 * d_model,), jnp.float32) * s          # in_proj_bias
        wo = jax.random.normal(ks[2], (d_model, d_model), jnp.float32) * s        # out_proj.weight
        bo = jax.random.normal(ks[3], (d_model,), jnp.float32) * s                # out_proj.bias
        w1 = jax.random.normal(ks[4], (d_hid, d_model), jnp.float32) * s          # linear1.weight
        b1 = jax.random.normal(ks[5], (d_hid,), jnp.float32) * s                  # linear1.bias
        w2 = jax.random.normal(ks[6], (d_model, d_hid), jnp.float32) * s          # linear2.weight
        b2 = jax.random.normal(ks[7], (d_model,), jnp.float32) * s                # linear2.bias

        acc["wqkv"].append(w_in.T)                       # (D, 3D): qkv = x @ in_proj_weight.T
        acc["bqkv"].append(b_in.reshape(1, 3 * d_model))
        acc["wo"].append(wo.T)                           # (D, D): attn @ out_proj.weight.T
        acc["bo"].append(bo.reshape(1, d_model))
        acc["w1"].append(w1.T)                           # (D, d_hid)
        acc["b1"].append(b1.reshape(1, d_hid))
        acc["w2"].append(w2.T)                           # (d_hid, D)
        acc["b2"].append(b2.reshape(1, d_model))
        acc["g1"].append(jnp.ones((1, d_model), jnp.float32))
        acc["be1"].append(jnp.zeros((1, d_model), jnp.float32))
        acc["g2"].append(jnp.ones((1, d_model), jnp.float32))
        acc["be2"].append(jnp.zeros((1, d_model), jnp.float32))
    return {n: jnp.stack(v) for n, v in acc.items()}


if __name__ == "__main__":
    d_model, nhead, d_hid, nlayers = 32, 4, 64, 2
    S, B = 8, 2

    key = jax.random.PRNGKey(0)
    k_src, k_par = jax.random.split(key)
    src = jax.random.normal(k_src, (S, B, d_model), jnp.float32)   # (seq, batch, d_model)
    params = init_params(k_par, d_model, nhead, d_hid, nlayers)

    out = state_encoder_forward(src, params, nhead, src_mask=None)
    out = jax.block_until_ready(out)
    assert out.shape == (S, B, d_model)
    assert bool(jnp.all(jnp.isfinite(out)))
    print("KERNEL_OK")
</pallas_src>

<mosaic_0001>
module attributes {stable_mosaic.version = 11 : i64} {
  func.func @_encoder_kernel(%arg0: memref<16x16xf32, #tpu.memory_space<vmem>>, %arg1: memref<16x32xf32, #tpu.memory_space<vmem>>, %arg2: memref<2x32x96xf32, #tpu.memory_space<vmem>>, %arg3: memref<2x1x96xf32, #tpu.memory_space<vmem>>, %arg4: memref<2x32x32xf32, #tpu.memory_space<vmem>>, %arg5: memref<2x1x32xf32, #tpu.memory_space<vmem>>, %arg6: memref<2x32x64xf32, #tpu.memory_space<vmem>>, %arg7: memref<2x1x64xf32, #tpu.memory_space<vmem>>, %arg8: memref<2x64x32xf32, #tpu.memory_space<vmem>>, %arg9: memref<2x1x32xf32, #tpu.memory_space<vmem>>, %arg10: memref<2x1x32xf32, #tpu.memory_space<vmem>>, %arg11: memref<2x1x32xf32, #tpu.memory_space<vmem>>, %arg12: memref<2x1x32xf32, #tpu.memory_space<vmem>>, %arg13: memref<2x1x32xf32, #tpu.memory_space<vmem>>, %arg14: memref<16x32xf32, #tpu.memory_space<vmem>>) attributes {dimension_semantics = [], scalar_prefetch = 0 : i64, scratch_operands = 0 : i64, tpu.core_type = #tpu.core_type<tc>} {
    %c0 = arith.constant 0 : index
    %c0_0 = arith.constant 0 : index
    %0 = vector.load %arg1[%c0, %c0_0] : memref<16x32xf32, #tpu.memory_space<vmem>>, vector<16x32xf32>
    %c0_1 = arith.constant 0 : index
    %c0_2 = arith.constant 0 : index
    %1 = vector.load %arg0[%c0_1, %c0_2] : memref<16x16xf32, #tpu.memory_space<vmem>>, vector<16x16xf32>
    %c0_3 = arith.constant 0 : index
    %c0_4 = arith.constant 0 : index
    %c0_5 = arith.constant 0 : index
    %2 = vector.load %arg2[%c0_3, %c0_4, %c0_5] : memref<2x32x96xf32, #tpu.memory_space<vmem>>, vector<1x32x96xf32>
    %3 = vector.shape_cast %2 : vector<1x32x96xf32> to vector<32x96xf32>
    %cst = arith.constant dense<0.000000e+00> : vector<16x96xf32>
    %4 = tpu.matmul %0, %3, %cst {dimension_numbers = #tpu.dot_dimension_numbers<[1], [0], [0], [1], [0, 0, 1, 1], [], []>} : vector<16x32xf32>, vector<32x96xf32>, vector<16x96xf32> -> vector<16x96xf32>
    %c0_6 = arith.constant 0 : index
    %c0_7 = arith.constant 0 : index
    %c0_8 = arith.constant 0 : index
    %5 = vector.load %arg3[%c0_6, %c0_7, %c0_8] : memref<2x1x96xf32, #tpu.memory_space<vmem>>, vector<1x1x96xf32>
    %6 = vector.shape_cast %5 : vector<1x1x96xf32> to vector<1x96xf32>
    %7 = vector.broadcast %6 : vector<1x96xf32> to vector<16x96xf32>
    %8 = arith.addf %4, %7 : vector<16x96xf32>
    %9 = vector.extract_strided_slice %8 {offsets = [0, 0], sizes = [16, 8], strides = [1, 1]} : vector<16x96xf32> to vector<16x8xf32>
    %10 = vector.extract_strided_slice %8 {offsets = [0, 32], sizes = [16, 8], strides = [1, 1]} : vector<16x96xf32> to vector<16x8xf32>
    %11 = vector.extract_strided_slice %8 {offsets = [0, 64], sizes = [16, 8], strides = [1, 1]} : vector<16x96xf32> to vector<16x8xf32>
    "tpu.trace_start"() <{level = 10 : i32, message = "nd,md->nm"}> : () -> ()
    %cst_9 = arith.constant dense<0.000000e+00> : vector<16x16xf32>
    %12 = tpu.matmul %9, %10, %cst_9 {dimension_numbers = #tpu.dot_dimension_numbers<[1], [1], [0], [0], [0, 0, 1, 0], [], []>} : vector<16x8xf32>, vector<16x8xf32>, vector<16x16xf32> -> vector<16x16xf32>
    "tpu.trace_stop"() : () -> ()
    %cst_10 = arith.constant 0.353553385 : f32
    %13 = vector.broadcast %cst_10 : f32 to vector<16x16xf32>
    %14 = arith.mulf %12, %13 : vector<16x16xf32>
    %15 = arith.addf %14, %1 : vector<16x16xf32>
    %cst_11 = arith.constant dense<0xFF800000> : vector<16xf32>
    %16 = vector.multi_reduction <maximumf>, %15, %cst_11 [1] : vector<16x16xf32> to vector<16xf32>
    %17 = vector.shape_cast %16 : vector<16xf32> to vector<16x1xf32>
    %18 = vector.broadcast %17 : vector<16x1xf32> to vector<16x16xf32>
    %19 = arith.subf %15, %18 : vector<16x16xf32>
    %20 = math.exp %19 : vector<16x16xf32>
    %cst_12 = arith.constant dense<0.000000e+00> : vector<16xf32>
    %21 = vector.multi_reduction <add>, %20, %cst_12 [1] : vector<16x16xf32> to vector<16xf32>
    %22 = vector.shape_cast %21 : vector<16xf32> to vector<16x1xf32>
    %23 = vector.broadcast %22 : vector<16x1xf32> to vector<16x16xf32>
    %24 = arith.divf %20, %23 : vector<16x16xf32>
    %cst_13 = arith.constant dense<0.000000e+00> : vector<16x8xf32>
    %25 = tpu.matmul %24, %11, %cst_13 {dimension_numbers = #tpu.dot_dimension_numbers<[1], [0], [0], [1], [0, 0, 1, 1], [], []>} : vector<16x16xf32>, vector<16x8xf32>, vector<16x8xf32> -> vector<16x8xf32>
    %26 = vector.extract_strided_slice %8 {offsets = [0, 8], sizes = [16, 8], strides = [1, 1]} : vector<16x96xf32> to vector<16x8xf32>
    %27 = vector.extract_strided_slice %8 {offsets = [0, 40], sizes = [16, 8], strides = [1, 1]} : vector<16x96xf32> to vector<16x8xf32>
    %28 = vector.extract_strided_slice %8 {offsets = [0, 72], sizes = [16, 8], strides = [1, 1]} : vector<16x96xf32> to vector<16x8xf32>
    "tpu.trace_start"() <{level = 10 : i32, message = "nd,md->nm"}> : () -> ()
    %cst_14 = arith.constant dense<0.000000e+00> : vector<16x16xf32>
    %29 = tpu.matmul %26, %27, %cst_14 {dimension_numbers = #tpu.dot_dimension_numbers<[1], [1], [0], [0], [0, 0, 1, 0], [], []>} : vector<16x8xf32>, vector<16x8xf32>, vector<16x16xf32> -> vector<16x16xf32>
    "tpu.trace_stop"() : () -> ()
    %cst_15 = arith.constant 0.353553385 : f32
    %30 = vector.broadcast %cst_15 : f32 to vector<16x16xf32>
    %31 = arith.mulf %29, %30 : vector<16x16xf32>
    %32 = arith.addf %31, %1 : vector<16x16xf32>
    %cst_16 = arith.constant dense<0xFF800000> : vector<16xf32>
    %33 = vector.multi_reduction <maximumf>, %32, %cst_16 [1] : vector<16x16xf32> to vector<16xf32>
    %34 = vector.shape_cast %33 : vector<16xf32> to vector<16x1xf32>
    %35 = vector.broadcast %34 : vector<16x1xf32> to vector<16x16xf32>
    %36 = arith.subf %32, %35 : vector<16x16xf32>
    %37 = math.exp %36 : vector<16x16xf32>
    %cst_17 = arith.constant dense<0.000000e+00> : vector<16xf32>
    %38 = vector.multi_reduction <add>, %37, %cst_17 [1] : vector<16x16xf32> to vector<16xf32>
    %39 = vector.shape_cast %38 : vector<16xf32> to vector<16x1xf32>
    %40 = vector.broadcast %39 : vector<16x1xf32> to vector<16x16xf32>
    %41 = arith.divf %37, %40 : vector<16x16xf32>
    %cst_18 = arith.constant dense<0.000000e+00> : vector<16x8xf32>
    %42 = tpu.matmul %41, %28, %cst_18 {dimension_numbers = #tpu.dot_dimension_numbers<[1], [0], [0], [1], [0, 0, 1, 1], [], []>} : vector<16x16xf32>, vector<16x8xf32>, vector<16x8xf32> -> vector<16x8xf32>
    %43 = vector.extract_strided_slice %8 {offsets = [0, 16], sizes = [16, 8], strides = [1, 1]} : vector<16x96xf32> to vector<16x8xf32>
    %44 = vector.extract_strided_slice %8 {offsets = [0, 48], sizes = [16, 8], strides = [1, 1]} : vector<16x96xf32> to vector<16x8xf32>
    %45 = vector.extract_strided_slice %8 {offsets = [0, 80], sizes = [16, 8], strides = [1, 1]} : vector<16x96xf32> to vector<16x8xf32>
    "tpu.trace_start"() <{level = 10 : i32, message = "nd,md->nm"}> : () -> ()
    %cst_19 = arith.constant dense<0.000000e+00> : vector<16x16xf32>
    %46 = tpu.matmul %43, %44, %cst_19 {dimension_numbers = #tpu.dot_dimension_numbers<[1], [1], [0], [0], [0, 0, 1, 0], [], []>} : vector<16x8xf32>, vector<16x8xf32>, vector<16x16xf32> -> vector<16x16xf32>
    "tpu.trace_stop"() : () -> ()
    %cst_20 = arith.constant 0.353553385 : f32
    %47 = vector.broadcast %cst_20 : f32 to vector<16x16xf32>
    %48 = arith.mulf %46, %47 : vector<16x16xf32>
    %49 = arith.addf %48, %1 : vector<16x16xf32>
    %cst_21 = arith.constant dense<0xFF800000> : vector<16xf32>
    %50 = vector.multi_reduction <maximumf>, %49, %cst_21 [1] : vector<16x16xf32> to vector<16xf32>
    %51 = vector.shape_cast %50 : vector<16xf32> to vector<16x1xf32>
    %52 = vector.broadcast %51 : vector<16x1xf32> to vector<16x16xf32>
    %53 = arith.subf %49, %52 : vector<16x16xf32>
    %54 = math.exp %53 : vector<16x16xf32>
    %cst_22 = arith.constant dense<0.000000e+00> : vector<16xf32>
    %55 = vector.multi_reduction <add>, %54, %cst_22 [1] : vector<16x16xf32> to vector<16xf32>
    %56 = vector.shape_cast %55 : vector<16xf32> to vector<16x1xf32>
    %57 = vector.broadcast %56 : vector<16x1xf32> to vector<16x16xf32>
    %58 = arith.divf %54, %57 : vector<16x16xf32>
    %cst_23 = arith.constant dense<0.000000e+00> : vector<16x8xf32>
    %59 = tpu.matmul %58, %45, %cst_23 {dimension_numbers = #tpu.dot_dimension_numbers<[1], [0], [0], [1], [0, 0, 1, 1], [], []>} : vector<16x16xf32>, vector<16x8xf32>, vector<16x8xf32> -> vector<16x8xf32>
    %60 = vector.extract_strided_slice %8 {offsets = [0, 24], sizes = [16, 8], strides = [1, 1]} : vector<16x96xf32> to vector<16x8xf32>
    %61 = vector.extract_strided_slice %8 {offsets = [0, 56], sizes = [16, 8], strides = [1, 1]} : vector<16x96xf32> to vector<16x8xf32>
    %62 = vector.extract_strided_slice %8 {offsets = [0, 88], sizes = [16, 8], strides = [1, 1]} : vector<16x96xf32> to vector<16x8xf32>
    "tpu.trace_start"() <{level = 10 : i32, message = "nd,md->nm"}> : () -> ()
    %cst_24 = arith.constant dense<0.000000e+00> : vector<16x16xf32>
    %63 = tpu.matmul %60, %61, %cst_24 {dimension_numbers = #tpu.dot_dimension_numbers<[1], [1], [0], [0], [0, 0, 1, 0], [], []>} : vector<16x8xf32>, vector<16x8xf32>, vector<16x16xf32> -> vector<16x16xf32>
    "tpu.trace_stop"() : () -> ()
    %cst_25 = arith.constant 0.353553385 : f32
    %64 = vector.broadcast %cst_25 : f32 to vector<16x16xf32>
    %65 = arith.mulf %63, %64 : vector<16x16xf32>
    %66 = arith.addf %65, %1 : vector<16x16xf32>
    %cst_26 = arith.constant dense<0xFF800000> : vector<16xf32>
    %67 = vector.multi_reduction <maximumf>, %66, %cst_26 [1] : vector<16x16xf32> to vector<16xf32>
    %68 = vector.shape_cast %67 : vector<16xf32> to vector<16x1xf32>
    %69 = vector.broadcast %68 : vector<16x1xf32> to vector<16x16xf32>
    %70 = arith.subf %66, %69 : vector<16x16xf32>
    %71 = math.exp %70 : vector<16x16xf32>
    %cst_27 = arith.constant dense<0.000000e+00> : vector<16xf32>
    %72 = vector.multi_reduction <add>, %71, %cst_27 [1] : vector<16x16xf32> to vector<16xf32>
    %73 = vector.shape_cast %72 : vector<16xf32> to vector<16x1xf32>
    %74 = vector.broadcast %73 : vector<16x1xf32> to vector<16x16xf32>
    %75 = arith.divf %71, %74 : vector<16x16xf32>
    %cst_28 = arith.constant dense<0.000000e+00> : vector<16x8xf32>
    %76 = tpu.matmul %75, %62, %cst_28 {dimension_numbers = #tpu.dot_dimension_numbers<[1], [0], [0], [1], [0, 0, 1, 1], [], []>} : vector<16x16xf32>, vector<16x8xf32>, vector<16x8xf32> -> vector<16x8xf32>
    %77 = tpu.concatenate %25, %42, %59, %76 in 1 : vector<16x8xf32>, vector<16x8xf32>, vector<16x8xf32>, vector<16x8xf32> -> vector<16x32xf32>
    %c0_29 = arith.constant 0 : index
    %c0_30 = arith.constant 0 : index
    %c0_31 = arith.constant 0 : index
    %78 = vector.load %arg4[%c0_29, %c0_30, %c0_31] : memref<2x32x32xf32, #tpu.memory_space<vmem>>, vector<1x32x32xf32>
    %79 = vector.shape_cast %78 : vector<1x32x32xf32> to vector<32x32xf32>
    %cst_32 = arith.constant dense<0.000000e+00> : vector<16x32xf32>
    %80 = tpu.matmul %77, %79, %cst_32 {dimension_numbers = #tpu.dot_dimension_numbers<[1], [0], [0], [1], [0, 0, 1, 1], [], []>} : vector<16x32xf32>, vector<32x32xf32>, vector<16x32xf32> -> vector<16x32xf32>
    %c0_33 = arith.constant 0 : index
    %c0_34 = arith.constant 0 : index
    %c0_35 = arith.constant 0 : index
    %81 = vector.load %arg5[%c0_33, %c0_34, %c0_35] : memref<2x1x32xf32, #tpu.memory_space<vmem>>, vector<1x1x32xf32>
    %82 = vector.shape_cast %81 : vector<1x1x32xf32> to vector<1x32xf32>
    %83 = vector.broadcast %82 : vector<1x32xf32> to vector<16x32xf32>
    %84 = arith.addf %80, %83 : vector<16x32xf32>
    %85 = arith.addf %0, %84 : vector<16x32xf32>
    %c0_36 = arith.constant 0 : index
    %c0_37 = arith.constant 0 : index
    %c0_38 = arith.constant 0 : index
    %86 = vector.load %arg10[%c0_36, %c0_37, %c0_38] : memref<2x1x32xf32, #tpu.memory_space<vmem>>, vector<1x1x32xf32>
    %87 = vector.shape_cast %86 : vector<1x1x32xf32> to vector<1x32xf32>
    %c0_39 = arith.constant 0 : index
    %c0_40 = arith.constant 0 : index
    %c0_41 = arith.constant 0 : index
    %88 = vector.load %arg11[%c0_39, %c0_40, %c0_41] : memref<2x1x32xf32, #tpu.memory_space<vmem>>, vector<1x1x32xf32>
    %89 = vector.shape_cast %88 : vector<1x1x32xf32> to vector<1x32xf32>
    %cst_42 = arith.constant dense<0.000000e+00> : vector<16xf32>
    %90 = vector.multi_reduction <add>, %85, %cst_42 [1] : vector<16x32xf32> to vector<16xf32>
    %91 = vector.shape_cast %90 : vector<16xf32> to vector<16x1xf32>
    %cst_43 = arith.constant 3.200000e+01 : f32
    %92 = vector.broadcast %cst_43 : f32 to vector<16x1xf32>
    %93 = arith.divf %91, %92 : vector<16x1xf32>
    %94 = vector.broadcast %93 : vector<16x1xf32> to vector<16x32xf32>
    %95 = arith.subf %85, %94 : vector<16x32xf32>
    %96 = arith.mulf %95, %95 : vector<16x32xf32>
    %cst_44 = arith.constant dense<0.000000e+00> : vector<16xf32>
    %97 = vector.multi_reduction <add>, %96, %cst_44 [1] : vector<16x32xf32> to vector<16xf32>
    %98 = vector.shape_cast %97 : vector<16xf32> to vector<16x1xf32>
    %cst_45 = arith.constant 3.200000e+01 : f32
    %99 = vector.broadcast %cst_45 : f32 to vector<16x1xf32>
    %100 = arith.divf %98, %99 : vector<16x1xf32>
    %101 = vector.broadcast %93 : vector<16x1xf32> to vector<16x32xf32>
    %102 = arith.subf %85, %101 : vector<16x32xf32>
    %cst_46 = arith.constant 9.99999974E-6 : f32
    %103 = vector.broadcast %cst_46 : f32 to vector<16x1xf32>
    %104 = arith.addf %100, %103 : vector<16x1xf32>
    %105 = math.rsqrt %104 : vector<16x1xf32>
    %106 = vector.broadcast %105 : vector<16x1xf32> to vector<16x32xf32>
    %107 = arith.mulf %102, %106 : vector<16x32xf32>
    %108 = vector.broadcast %87 : vector<1x32xf32> to vector<16x32xf32>
    %109 = arith.mulf %107, %108 : vector<16x32xf32>
    %110 = vector.broadcast %89 : vector<1x32xf32> to vector<16x32xf32>
    %111 = arith.addf %109, %110 : vector<16x32xf32>
    %c0_47 = arith.constant 0 : index
    %c0_48 = arith.constant 0 : index
    %c0_49 = arith.constant 0 : index
    %112 = vector.load %arg6[%c0_47, %c0_48, %c0_49] : memref<2x32x64xf32, #tpu.memory_space<vmem>>, vector<1x32x64xf32>
    %113 = vector.shape_cast %112 : vector<1x32x64xf32> to vector<32x64xf32>
    %cst_50 = arith.constant dense<0.000000e+00> : vector<16x64xf32>
    %114 = tpu.matmul %111, %113, %cst_50 {dimension_numbers = #tpu.dot_dimension_numbers<[1], [0], [0], [1], [0, 0, 1, 1], [], []>} : vector<16x32xf32>, vector<32x64xf32>, vector<16x64xf32> -> vector<16x64xf32>
    %c0_51 = arith.constant 0 : index
    %c0_52 = arith.constant 0 : index
    %c0_53 = arith.constant 0 : index
    %115 = vector.load %arg7[%c0_51, %c0_52, %c0_53] : memref<2x1x64xf32, #tpu.memory_space<vmem>>, vector<1x1x64xf32>
    %116 = vector.shape_cast %115 : vector<1x1x64xf32> to vector<1x64xf32>
    %117 = vector.broadcast %116 : vector<1x64xf32> to vector<16x64xf32>
    %118 = arith.addf %114, %117 : vector<16x64xf32>
    %cst_54 = arith.constant 5.000000e-01 : f32
    %119 = vector.broadcast %cst_54 : f32 to vector<16x64xf32>
    %120 = arith.mulf %119, %118 : vector<16x64xf32>
    %cst_55 = arith.constant 0.707106769 : f32
    %121 = vector.broadcast %cst_55 : f32 to vector<16x64xf32>
    %122 = arith.mulf %118, %121 : vector<16x64xf32>
    %123 = math.absf %122 : vector<16x64xf32>
    %cst_56 = arith.constant 0.327591091 : f32
    %124 = vector.broadcast %cst_56 : f32 to vector<16x64xf32>
    %125 = arith.mulf %124, %123 : vector<16x64xf32>
    %cst_57 = arith.constant 1.000000e+00 : f32
    %126 = vector.broadcast %cst_57 : f32 to vector<16x64xf32>
    %127 = arith.addf %126, %125 : vector<16x64xf32>
    %cst_58 = arith.constant 1.000000e+00 : f32
    %128 = vector.broadcast %cst_58 : f32 to vector<16x64xf32>
    %129 = arith.divf %128, %127 : vector<16x64xf32>
    %cst_59 = arith.constant 1.06140542 : f32
    %130 = vector.broadcast %cst_59 : f32 to vector<16x64xf32>
    %131 = arith.mulf %130, %129 : vector<16x64xf32>
    %cst_60 = arith.constant -1.45315206 : f32
    %132 = vector.broadcast %cst_60 : f32 to vector<16x64xf32>
    %133 = arith.addf %131, %132 : vector<16x64xf32>
    %134 = arith.mulf %133, %129 : vector<16x64xf32>
    %cst_61 = arith.constant 1.42141378 : f32
    %135 = vector.broadcast %cst_61 : f32 to vector<16x64xf32>
    %136 = arith.addf %134, %135 : vector<16x64xf32>
    %137 = arith.mulf %136, %129 : vector<16x64xf32>
    %cst_62 = arith.constant -0.284496725 : f32
    %138 = vector.broadcast %cst_62 : f32 to vector<16x64xf32>
    %139 = arith.addf %137, %138 : vector<16x64xf32>
    %140 = arith.mulf %139, %129 : vector<16x64xf32>
    %cst_63 = arith.constant 0.254829586 : f32
    %141 = vector.broadcast %cst_63 : f32 to vector<16x64xf32>
    %142 = arith.addf %140, %141 : vector<16x64xf32>
    %143 = arith.mulf %142, %129 : vector<16x64xf32>
    %cst_64 = arith.constant 0.000000e+00 : f32
    %144 = vector.broadcast %cst_64 : f32 to vector<16x64xf32>
    %145 = arith.subf %144, %123 : vector<16x64xf32>
    %146 = arith.mulf %145, %123 : vector<16x64xf32>
    %147 = math.exp %146 : vector<16x64xf32>
    %148 = arith.mulf %143, %147 : vector<16x64xf32>
    %cst_65 = arith.constant 1.000000e+00 : f32
    %149 = vector.broadcast %cst_65 : f32 to vector<16x64xf32>
    %150 = arith.subf %149, %148 : vector<16x64xf32>
    %cst_66 = arith.constant 0.000000e+00 : f32
    %151 = vector.broadcast %cst_66 : f32 to vector<16x64xf32>
    %152 = arith.cmpf oge, %122, %151 : vector<16x64xf32>
    %cst_67 = arith.constant 0.000000e+00 : f32
    %153 = vector.broadcast %cst_67 : f32 to vector<16x64xf32>
    %154 = arith.subf %153, %150 : vector<16x64xf32>
    %155 = arith.select %152, %150, %154 : vector<16x64xi1>, vector<16x64xf32>
    %cst_68 = arith.constant 1.000000e+00 : f32
    %156 = vector.broadcast %cst_68 : f32 to vector<16x64xf32>
    %157 = arith.addf %156, %155 : vector<16x64xf32>
    %158 = arith.mulf %120, %157 : vector<16x64xf32>
    %c0_69 = arith.constant 0 : index
    %c0_70 = arith.constant 0 : index
    %c0_71 = arith.constant 0 : index
    %159 = vector.load %arg8[%c0_69, %c0_70, %c0_71] : memref<2x64x32xf32, #tpu.memory_space<vmem>>, vector<1x64x32xf32>
    %160 = vector.shape_cast %159 : vector<1x64x32xf32> to vector<64x32xf32>
    %cst_72 = arith.constant dense<0.000000e+00> : vector<16x32xf32>
    %161 = tpu.matmul %158, %160, %cst_72 {dimension_numbers = #tpu.dot_dimension_numbers<[1], [0], [0], [1], [0, 0, 1, 1], [], []>} : vector<16x64xf32>, vector<64x32xf32>, vector<16x32xf32> -> vector<16x32xf32>
    %c0_73 = arith.constant 0 : index
    %c0_74 = arith.constant 0 : index
    %c0_75 = arith.constant 0 : index
    %162 = vector.load %arg9[%c0_73, %c0_74, %c0_75] : memref<2x1x32xf32, #tpu.memory_space<vmem>>, vector<1x1x32xf32>
    %163 = vector.shape_cast %162 : vector<1x1x32xf32> to vector<1x32xf32>
    %164 = vector.broadcast %163 : vector<1x32xf32> to vector<16x32xf32>
    %165 = arith.addf %161, %164 : vector<16x32xf32>
    %166 = arith.addf %111, %165 : vector<16x32xf32>
    %c0_76 = arith.constant 0 : index
    %c0_77 = arith.constant 0 : index
    %c0_78 = arith.constant 0 : index
    %167 = vector.load %arg12[%c0_76, %c0_77, %c0_78] : memref<2x1x32xf32, #tpu.memory_space<vmem>>, vector<1x1x32xf32>
    %168 = vector.shape_cast %167 : vector<1x1x32xf32> to vector<1x32xf32>
    %c0_79 = arith.constant 0 : index
    %c0_80 = arith.constant 0 : index
    %c0_81 = arith.constant 0 : index
    %169 = vector.load %arg13[%c0_79, %c0_80, %c0_81] : memref<2x1x32xf32, #tpu.memory_space<vmem>>, vector<1x1x32xf32>
    %170 = vector.shape_cast %169 : vector<1x1x32xf32> to vector<1x32xf32>
    %cst_82 = arith.constant dense<0.000000e+00> : vector<16xf32>
    %171 = vector.multi_reduction <add>, %166, %cst_82 [1] : vector<16x32xf32> to vector<16xf32>
    %172 = vector.shape_cast %171 : vector<16xf32> to vector<16x1xf32>
    %cst_83 = arith.constant 3.200000e+01 : f32
    %173 = vector.broadcast %cst_83 : f32 to vector<16x1xf32>
    %174 = arith.divf %172, %173 : vector<16x1xf32>
    %175 = vector.broadcast %174 : vector<16x1xf32> to vector<16x32xf32>
    %176 = arith.subf %166, %175 : vector<16x32xf32>
    %177 = arith.mulf %176, %176 : vector<16x32xf32>
    %cst_84 = arith.constant dense<0.000000e+00> : vector<16xf32>
    %178 = vector.multi_reduction <add>, %177, %cst_84 [1] : vector<16x32xf32> to vector<16xf32>
    %179 = vector.shape_cast %178 : vector<16xf32> to vector<16x1xf32>
    %cst_85 = arith.constant 3.200000e+01 : f32
    %180 = vector.broadcast %cst_85 : f32 to vector<16x1xf32>
    %181 = arith.divf %179, %180 : vector<16x1xf32>
    %182 = vector.broadcast %174 : vector<16x1xf32> to vector<16x32xf32>
    %183 = arith.subf %166, %182 : vector<16x32xf32>
    %cst_86 = arith.constant 9.99999974E-6 : f32
    %184 = vector.broadcast %cst_86 : f32 to vector<16x1xf32>
    %185 = arith.addf %181, %184 : vector<16x1xf32>
    %186 = math.rsqrt %185 : vector<16x1xf32>
    %187 = vector.broadcast %186 : vector<16x1xf32> to vector<16x32xf32>
    %188 = arith.mulf %183, %187 : vector<16x32xf32>
    %189 = vector.broadcast %168 : vector<1x32xf32> to vector<16x32xf32>
    %190 = arith.mulf %188, %189 : vector<16x32xf32>
    %191 = vector.broadcast %170 : vector<1x32xf32> to vector<16x32xf32>
    %192 = arith.addf %190, %191 : vector<16x32xf32>
    %c1 = arith.constant 1 : index
    %c0_87 = arith.constant 0 : index
    %c0_88 = arith.constant 0 : index
    %193 = vector.load %arg2[%c1, %c0_87, %c0_88] : memref<2x32x96xf32, #tpu.memory_space<vmem>>, vector<1x32x96xf32>
    %194 = vector.shape_cast %193 : vector<1x32x96xf32> to vector<32x96xf32>
    %cst_89 = arith.constant dense<0.000000e+00> : vector<16x96xf32>
    %195 = tpu.matmul %192, %194, %cst_89 {dimension_numbers = #tpu.dot_dimension_numbers<[1], [0], [0], [1], [0, 0, 1, 1], [], []>} : vector<16x32xf32>, vector<32x96xf32>, vector<16x96xf32> -> vector<16x96xf32>
    %c1_90 = arith.constant 1 : index
    %c0_91 = arith.constant 0 : index
    %c0_92 = arith.constant 0 : index
    %196 = vector.load %arg3[%c1_90, %c0_91, %c0_92] : memref<2x1x96xf32, #tpu.memory_space<vmem>>, vector<1x1x96xf32>
    %197 = vector.shape_cast %196 : vector<1x1x96xf32> to vector<1x96xf32>
    %198 = vector.broadcast %197 : vector<1x96xf32> to vector<16x96xf32>
    %199 = arith.addf %195, %198 : vector<16x96xf32>
    %200 = vector.extract_strided_slice %199 {offsets = [0, 0], sizes = [16, 8], strides = [1, 1]} : vector<16x96xf32> to vector<16x8xf32>
    %201 = vector.extract_strided_slice %199 {offsets = [0, 32], sizes = [16, 8], strides = [1, 1]} : vector<16x96xf32> to vector<16x8xf32>
    %202 = vector.extract_strided_slice %199 {offsets = [0, 64], sizes = [16, 8], strides = [1, 1]} : vector<16x96xf32> to vector<16x8xf32>
    "tpu.trace_start"() <{level = 10 : i32, message = "nd,md->nm"}> : () -> ()
    %cst_93 = arith.constant dense<0.000000e+00> : vector<16x16xf32>
    %203 = tpu.matmul %200, %201, %cst_93 {dimension_numbers = #tpu.dot_dimension_numbers<[1], [1], [0], [0], [0, 0, 1, 0], [], []>} : vector<16x8xf32>, vector<16x8xf32>, vector<16x16xf32> -> vector<16x16xf32>
    "tpu.trace_stop"() : () -> ()
    %cst_94 = arith.constant 0.353553385 : f32
    %204 = vector.broadcast %cst_94 : f32 to vector<16x16xf32>
    %205 = arith.mulf %203, %204 : vector<16x16xf32>
    %206 = arith.addf %205, %1 : vector<16x16xf32>
    %cst_95 = arith.constant dense<0xFF800000> : vector<16xf32>
    %207 = vector.multi_reduction <maximumf>, %206, %cst_95 [1] : vector<16x16xf32> to vector<16xf32>
    %208 = vector.shape_cast %207 : vector<16xf32> to vector<16x1xf32>
    %209 = vector.broadcast %208 : vector<16x1xf32> to vector<16x16xf32>
    %210 = arith.subf %206, %209 : vector<16x16xf32>
    %211 = math.exp %210 : vector<16x16xf32>
    %cst_96 = arith.constant dense<0.000000e+00> : vector<16xf32>
    %212 = vector.multi_reduction <add>, %211, %cst_96 [1] : vector<16x16xf32> to vector<16xf32>
    %213 = vector.shape_cast %212 : vector<16xf32> to vector<16x1xf32>
    %214 = vector.broadcast %213 : vector<16x1xf32> to vector<16x16xf32>
    %215 = arith.divf %211, %214 : vector<16x16xf32>
    %cst_97 = arith.constant dense<0.000000e+00> : vector<16x8xf32>
    %216 = tpu.matmul %215, %202, %cst_97 {dimension_numbers = #tpu.dot_dimension_numbers<[1], [0], [0], [1], [0, 0, 1, 1], [], []>} : vector<16x16xf32>, vector<16x8xf32>, vector<16x8xf32> -> vector<16x8xf32>
    %217 = vector.extract_strided_slice %199 {offsets = [0, 8], sizes = [16, 8], strides = [1, 1]} : vector<16x96xf32> to vector<16x8xf32>
    %218 = vector.extract_strided_slice %199 {offsets = [0, 40], sizes = [16, 8], strides = [1, 1]} : vector<16x96xf32> to vector<16x8xf32>
    %219 = vector.extract_strided_slice %199 {offsets = [0, 72], sizes = [16, 8], strides = [1, 1]} : vector<16x96xf32> to vector<16x8xf32>
    "tpu.trace_start"() <{level = 10 : i32, message = "nd,md->nm"}> : () -> ()
    %cst_98 = arith.constant dense<0.000000e+00> : vector<16x16xf32>
    %220 = tpu.matmul %217, %218, %cst_98 {dimension_numbers = #tpu.dot_dimension_numbers<[1], [1], [0], [0], [0, 0, 1, 0], [], []>} : vector<16x8xf32>, vector<16x8xf32>, vector<16x16xf32> -> vector<16x16xf32>
    "tpu.trace_stop"() : () -> ()
    %cst_99 = arith.constant 0.353553385 : f32
    %221 = vector.broadcast %cst_99 : f32 to vector<16x16xf32>
    %222 = arith.mulf %220, %221 : vector<16x16xf32>
    %223 = arith.addf %222, %1 : vector<16x16xf32>
    %cst_100 = arith.constant dense<0xFF800000> : vector<16xf32>
    %224 = vector.multi_reduction <maximumf>, %223, %cst_100 [1] : vector<16x16xf32> to vector<16xf32>
    %225 = vector.shape_cast %224 : vector<16xf32> to vector<16x1xf32>
    %226 = vector.broadcast %225 : vector<16x1xf32> to vector<16x16xf32>
    %227 = arith.subf %223, %226 : vector<16x16xf32>
    %228 = math.exp %227 : vector<16x16xf32>
    %cst_101 = arith.constant dense<0.000000e+00> : vector<16xf32>
    %229 = vector.multi_reduction <add>, %228, %cst_101 [1] : vector<16x16xf32> to vector<16xf32>
    %230 = vector.shape_cast %229 : vector<16xf32> to vector<16x1xf32>
    %231 = vector.broadcast %230 : vector<16x1xf32> to vector<16x16xf32>
    %232 = arith.divf %228, %231 : vector<16x16xf32>
    %cst_102 = arith.constant dense<0.000000e+00> : vector<16x8xf32>
    %233 = tpu.matmul %232, %219, %cst_102 {dimension_numbers = #tpu.dot_dimension_numbers<[1], [0], [0], [1], [0, 0, 1, 1], [], []>} : vector<16x16xf32>, vector<16x8xf32>, vector<16x8xf32> -> vector<16x8xf32>
    %234 = vector.extract_strided_slice %199 {offsets = [0, 16], sizes = [16, 8], strides = [1, 1]} : vector<16x96xf32> to vector<16x8xf32>
    %235 = vector.extract_strided_slice %199 {offsets = [0, 48], sizes = [16, 8], strides = [1, 1]} : vector<16x96xf32> to vector<16x8xf32>
    %236 = vector.extract_strided_slice %199 {offsets = [0, 80], sizes = [16, 8], strides = [1, 1]} : vector<16x96xf32> to vector<16x8xf32>
    "tpu.trace_start"() <{level = 10 : i32, message = "nd,md->nm"}> : () -> ()
    %cst_103 = arith.constant dense<0.000000e+00> : vector<16x16xf32>
    %237 = tpu.matmul %234, %235, %cst_103 {dimension_numbers = #tpu.dot_dimension_numbers<[1], [1], [0], [0], [0, 0, 1, 0], [], []>} : vector<16x8xf32>, vector<16x8xf32>, vector<16x16xf32> -> vector<16x16xf32>
    "tpu.trace_stop"() : () -> ()
    %cst_104 = arith.constant 0.353553385 : f32
    %238 = vector.broadcast %cst_104 : f32 to vector<16x16xf32>
    %239 = arith.mulf %237, %238 : vector<16x16xf32>
    %240 = arith.addf %239, %1 : vector<16x16xf32>
    %cst_105 = arith.constant dense<0xFF800000> : vector<16xf32>
    %241 = vector.multi_reduction <maximumf>, %240, %cst_105 [1] : vector<16x16xf32> to vector<16xf32>
    %242 = vector.shape_cast %241 : vector<16xf32> to vector<16x1xf32>
    %243 = vector.broadcast %242 : vector<16x1xf32> to vector<16x16xf32>
    %244 = arith.subf %240, %243 : vector<16x16xf32>
    %245 = math.exp %244 : vector<16x16xf32>
    %cst_106 = arith.constant dense<0.000000e+00> : vector<16xf32>
    %246 = vector.multi_reduction <add>, %245, %cst_106 [1] : vector<16x16xf32> to vector<16xf32>
    %247 = vector.shape_cast %246 : vector<16xf32> to vector<16x1xf32>
    %248 = vector.broadcast %247 : vector<16x1xf32> to vector<16x16xf32>
    %249 = arith.divf %245, %248 : vector<16x16xf32>
    %cst_107 = arith.constant dense<0.000000e+00> : vector<16x8xf32>
    %250 = tpu.matmul %249, %236, %cst_107 {dimension_numbers = #tpu.dot_dimension_numbers<[1], [0], [0], [1], [0, 0, 1, 1], [], []>} : vector<16x16xf32>, vector<16x8xf32>, vector<16x8xf32> -> vector<16x8xf32>
    %251 = vector.extract_strided_slice %199 {offsets = [0, 24], sizes = [16, 8], strides = [1, 1]} : vector<16x96xf32> to vector<16x8xf32>
    %252 = vector.extract_strided_slice %199 {offsets = [0, 56], sizes = [16, 8], strides = [1, 1]} : vector<16x96xf32> to vector<16x8xf32>
    %253 = vector.extract_strided_slice %199 {offsets = [0, 88], sizes = [16, 8], strides = [1, 1]} : vector<16x96xf32> to vector<16x8xf32>
    "tpu.trace_start"() <{level = 10 : i32, message = "nd,md->nm"}> : () -> ()
    %cst_108 = arith.constant dense<0.000000e+00> : vector<16x16xf32>
    %254 = tpu.matmul %251, %252, %cst_108 {dimension_numbers = #tpu.dot_dimension_numbers<[1], [1], [0], [0], [0, 0, 1, 0], [], []>} : vector<16x8xf32>, vector<16x8xf32>, vector<16x16xf32> -> vector<16x16xf32>
    "tpu.trace_stop"() : () -> ()
    %cst_109 = arith.constant 0.353553385 : f32
    %255 = vector.broadcast %cst_109 : f32 to vector<16x16xf32>
    %256 = arith.mulf %254, %255 : vector<16x16xf32>
    %257 = arith.addf %256, %1 : vector<16x16xf32>
    %cst_110 = arith.constant dense<0xFF800000> : vector<16xf32>
    %258 = vector.multi_reduction <maximumf>, %257, %cst_110 [1] : vector<16x16xf32> to vector<16xf32>
    %259 = vector.shape_cast %258 : vector<16xf32> to vector<16x1xf32>
    %260 = vector.broadcast %259 : vector<16x1xf32> to vector<16x16xf32>
    %261 = arith.subf %257, %260 : vector<16x16xf32>
    %262 = math.exp %261 : vector<16x16xf32>
    %cst_111 = arith.constant dense<0.000000e+00> : vector<16xf32>
    %263 = vector.multi_reduction <add>, %262, %cst_111 [1] : vector<16x16xf32> to vector<16xf32>
    %264 = vector.shape_cast %263 : vector<16xf32> to vector<16x1xf32>
    %265 = vector.broadcast %264 : vector<16x1xf32> to vector<16x16xf32>
    %266 = arith.divf %262, %265 : vector<16x16xf32>
    %cst_112 = arith.constant dense<0.000000e+00> : vector<16x8xf32>
    %267 = tpu.matmul %266, %253, %cst_112 {dimension_numbers = #tpu.dot_dimension_numbers<[1], [0], [0], [1], [0, 0, 1, 1], [], []>} : vector<16x16xf32>, vector<16x8xf32>, vector<16x8xf32> -> vector<16x8xf32>
    %268 = tpu.concatenate %216, %233, %250, %267 in 1 : vector<16x8xf32>, vector<16x8xf32>, vector<16x8xf32>, vector<16x8xf32> -> vector<16x32xf32>
    %c1_113 = arith.constant 1 : index
    %c0_114 = arith.constant 0 : index
    %c0_115 = arith.constant 0 : index
    %269 = vector.load %arg4[%c1_113, %c0_114, %c0_115] : memref<2x32x32xf32, #tpu.memory_space<vmem>>, vector<1x32x32xf32>
    %270 = vector.shape_cast %269 : vector<1x32x32xf32> to vector<32x32xf32>
    %cst_116 = arith.constant dense<0.000000e+00> : vector<16x32xf32>
    %271 = tpu.matmul %268, %270, %cst_116 {dimension_numbers = #tpu.dot_dimension_numbers<[1], [0], [0], [1], [0, 0, 1, 1], [], []>} : vector<16x32xf32>, vector<32x32xf32>, vector<16x32xf32> -> vector<16x32xf32>
    %c1_117 = arith.constant 1 : index
    %c0_118 = arith.constant 0 : index
    %c0_119 = arith.constant 0 : index
    %272 = vector.load %arg5[%c1_117, %c0_118, %c0_119] : memref<2x1x32xf32, #tpu.memory_space<vmem>>, vector<1x1x32xf32>
    %273 = vector.shape_cast %272 : vector<1x1x32xf32> to vector<1x32xf32>
    %274 = vector.broadcast %273 : vector<1x32xf32> to vector<16x32xf32>
    %275 = arith.addf %271, %274 : vector<16x32xf32>
    %276 = arith.addf %192, %275 : vector<16x32xf32>
    %c1_120 = arith.constant 1 : index
    %c0_121 = arith.constant 0 : index
    %c0_122 = arith.constant 0 : index
    %277 = vector.load %arg10[%c1_120, %c0_121, %c0_122] : memref<2x1x32xf32, #tpu.memory_space<vmem>>, vector<1x1x32xf32>
    %278 = vector.shape_cast %277 : vector<1x1x32xf32> to vector<1x32xf32>
    %c1_123 = arith.constant 1 : index
    %c0_124 = arith.constant 0 : index
    %c0_125 = arith.constant 0 : index
    %279 = vector.load %arg11[%c1_123, %c0_124, %c0_125] : memref<2x1x32xf32, #tpu.memory_space<vmem>>, vector<1x1x32xf32>
    %280 = vector.shape_cast %279 : vector<1x1x32xf32> to vector<1x32xf32>
    %cst_126 = arith.constant dense<0.000000e+00> : vector<16xf32>
    %281 = vector.multi_reduction <add>, %276, %cst_126 [1] : vector<16x32xf32> to vector<16xf32>
    %282 = vector.shape_cast %281 : vector<16xf32> to vector<16x1xf32>
    %cst_127 = arith.constant 3.200000e+01 : f32
    %283 = vector.broadcast %cst_127 : f32 to vector<16x1xf32>
    %284 = arith.divf %282, %283 : vector<16x1xf32>
    %285 = vector.broadcast %284 : vector<16x1xf32> to vector<16x32xf32>
    %286 = arith.subf %276, %285 : vector<16x32xf32>
    %287 = arith.mulf %286, %286 : vector<16x32xf32>
    %cst_128 = arith.constant dense<0.000000e+00> : vector<16xf32>
    %288 = vector.multi_reduction <add>, %287, %cst_128 [1] : vector<16x32xf32> to vector<16xf32>
    %289 = vector.shape_cast %288 : vector<16xf32> to vector<16x1xf32>
    %cst_129 = arith.constant 3.200000e+01 : f32
    %290 = vector.broadcast %cst_129 : f32 to vector<16x1xf32>
    %291 = arith.divf %289, %290 : vector<16x1xf32>
    %292 = vector.broadcast %284 : vector<16x1xf32> to vector<16x32xf32>
    %293 = arith.subf %276, %292 : vector<16x32xf32>
    %cst_130 = arith.constant 9.99999974E-6 : f32
    %294 = vector.broadcast %cst_130 : f32 to vector<16x1xf32>
    %295 = arith.addf %291, %294 : vector<16x1xf32>
    %296 = math.rsqrt %295 : vector<16x1xf32>
    %297 = vector.broadcast %296 : vector<16x1xf32> to vector<16x32xf32>
    %298 = arith.mulf %293, %297 : vector<16x32xf32>
    %299 = vector.broadcast %278 : vector<1x32xf32> to vector<16x32xf32>
    %300 = arith.mulf %298, %299 : vector<16x32xf32>
    %301 = vector.broadcast %280 : vector<1x32xf32> to vector<16x32xf32>
    %302 = arith.addf %300, %301 : vector<16x32xf32>
    %c1_131 = arith.constant 1 : index
    %c0_132 = arith.constant 0 : index
    %c0_133 = arith.constant 0 : index
    %303 = vector.load %arg6[%c1_131, %c0_132, %c0_133] : memref<2x32x64xf32, #tpu.memory_space<vmem>>, vector<1x32x64xf32>
    %304 = vector.shape_cast %303 : vector<1x32x64xf32> to vector<32x64xf32>
    %cst_134 = arith.constant dense<0.000000e+00> : vector<16x64xf32>
    %305 = tpu.matmul %302, %304, %cst_134 {dimension_numbers = #tpu.dot_dimension_numbers<[1], [0], [0], [1], [0, 0, 1, 1], [], []>} : vector<16x32xf32>, vector<32x64xf32>, vector<16x64xf32> -> vector<16x64xf32>
    %c1_135 = arith.constant 1 : index
    %c0_136 = arith.constant 0 : index
    %c0_137 = arith.constant 0 : index
    %306 = vector.load %arg7[%c1_135, %c0_136, %c0_137] : memref<2x1x64xf32, #tpu.memory_space<vmem>>, vector<1x1x64xf32>
    %307 = vector.shape_cast %306 : vector<1x1x64xf32> to vector<1x64xf32>
    %308 = vector.broadcast %307 : vector<1x64xf32> to vector<16x64xf32>
    %309 = arith.addf %305, %308 : vector<16x64xf32>
    %cst_138 = arith.constant 5.000000e-01 : f32
    %310 = vector.broadcast %cst_138 : f32 to vector<16x64xf32>
    %311 = arith.mulf %310, %309 : vector<16x64xf32>
    %cst_139 = arith.constant 0.707106769 : f32
    %312 = vector.broadcast %cst_139 : f32 to vector<16x64xf32>
    %313 = arith.mulf %309, %312 : vector<16x64xf32>
    %314 = math.absf %313 : vector<16x64xf32>
    %cst_140 = arith.constant 0.327591091 : f32
    %315 = vector.broadcast %cst_140 : f32 to vector<16x64xf32>
    %316 = arith.mulf %315, %314 : vector<16x64xf32>
    %cst_141 = arith.constant 1.000000e+00 : f32
    %317 = vector.broadcast %cst_141 : f32 to vector<16x64xf32>
    %318 = arith.addf %317, %316 : vector<16x64xf32>
    %cst_142 = arith.constant 1.000000e+00 : f32
    %319 = vector.broadcast %cst_142 : f32 to vector<16x64xf32>
    %320 = arith.divf %319, %318 : vector<16x64xf32>
    %cst_143 = arith.constant 1.06140542 : f32
    %321 = vector.broadcast %cst_143 : f32 to vector<16x64xf32>
    %322 = arith.mulf %321, %320 : vector<16x64xf32>
    %cst_144 = arith.constant -1.45315206 : f32
    %323 = vector.broadcast %cst_144 : f32 to vector<16x64xf32>
    %324 = arith.addf %322, %323 : vector<16x64xf32>
    %325 = arith.mulf %324, %320 : vector<16x64xf32>
    %cst_145 = arith.constant 1.42141378 : f32
    %326 = vector.broadcast %cst_145 : f32 to vector<16x64xf32>
    %327 = arith.addf %325, %326 : vector<16x64xf32>
    %328 = arith.mulf %327, %320 : vector<16x64xf32>
    %cst_146 = arith.constant -0.284496725 : f32
    %329 = vector.broadcast %cst_146 : f32 to vector<16x64xf32>
    %330 = arith.addf %328, %329 : vector<16x64xf32>
    %331 = arith.mulf %330, %320 : vector<16x64xf32>
    %cst_147 = arith.constant 0.254829586 : f32
    %332 = vector.broadcast %cst_147 : f32 to vector<16x64xf32>
    %333 = arith.addf %331, %332 : vector<16x64xf32>
    %334 = arith.mulf %333, %320 : vector<16x64xf32>
    %cst_148 = arith.constant 0.000000e+00 : f32
    %335 = vector.broadcast %cst_148 : f32 to vector<16x64xf32>
    %336 = arith.subf %335, %314 : vector<16x64xf32>
    %337 = arith.mulf %336, %314 : vector<16x64xf32>
    %338 = math.exp %337 : vector<16x64xf32>
    %339 = arith.mulf %334, %338 : vector<16x64xf32>
    %cst_149 = arith.constant 1.000000e+00 : f32
    %340 = vector.broadcast %cst_149 : f32 to vector<16x64xf32>
    %341 = arith.subf %340, %339 : vector<16x64xf32>
    %cst_150 = arith.constant 0.000000e+00 : f32
    %342 = vector.broadcast %cst_150 : f32 to vector<16x64xf32>
    %343 = arith.cmpf oge, %313, %342 : vector<16x64xf32>
    %cst_151 = arith.constant 0.000000e+00 : f32
    %344 = vector.broadcast %cst_151 : f32 to vector<16x64xf32>
    %345 = arith.subf %344, %341 : vector<16x64xf32>
    %346 = arith.select %343, %341, %345 : vector<16x64xi1>, vector<16x64xf32>
    %cst_152 = arith.constant 1.000000e+00 : f32
    %347 = vector.broadcast %cst_152 : f32 to vector<16x64xf32>
    %348 = arith.addf %347, %346 : vector<16x64xf32>
    %349 = arith.mulf %311, %348 : vector<16x64xf32>
    %c1_153 = arith.constant 1 : index
    %c0_154 = arith.constant 0 : index
    %c0_155 = arith.constant 0 : index
    %350 = vector.load %arg8[%c1_153, %c0_154, %c0_155] : memref<2x64x32xf32, #tpu.memory_space<vmem>>, vector<1x64x32xf32>
    %351 = vector.shape_cast %350 : vector<1x64x32xf32> to vector<64x32xf32>
    %cst_156 = arith.constant dense<0.000000e+00> : vector<16x32xf32>
    %352 = tpu.matmul %349, %351, %cst_156 {dimension_numbers = #tpu.dot_dimension_numbers<[1], [0], [0], [1], [0, 0, 1, 1], [], []>} : vector<16x64xf32>, vector<64x32xf32>, vector<16x32xf32> -> vector<16x32xf32>
    %c1_157 = arith.constant 1 : index
    %c0_158 = arith.constant 0 : index
    %c0_159 = arith.constant 0 : index
    %353 = vector.load %arg9[%c1_157, %c0_158, %c0_159] : memref<2x1x32xf32, #tpu.memory_space<vmem>>, vector<1x1x32xf32>
    %354 = vector.shape_cast %353 : vector<1x1x32xf32> to vector<1x32xf32>
    %355 = vector.broadcast %354 : vector<1x32xf32> to vector<16x32xf32>
    %356 = arith.addf %352, %355 : vector<16x32xf32>
    %357 = arith.addf %302, %356 : vector<16x32xf32>
    %c1_160 = arith.constant 1 : index
    %c0_161 = arith.constant 0 : index
    %c0_162 = arith.constant 0 : index
    %358 = vector.load %arg12[%c1_160, %c0_161, %c0_162] : memref<2x1x32xf32, #tpu.memory_space<vmem>>, vector<1x1x32xf32>
    %359 = vector.shape_cast %358 : vector<1x1x32xf32> to vector<1x32xf32>
    %c1_163 = arith.constant 1 : index
    %c0_164 = arith.constant 0 : index
    %c0_165 = arith.constant 0 : index
    %360 = vector.load %arg13[%c1_163, %c0_164, %c0_165] : memref<2x1x32xf32, #tpu.memory_space<vmem>>, vector<1x1x32xf32>
    %361 = vector.shape_cast %360 : vector<1x1x32xf32> to vector<1x32xf32>
    %cst_166 = arith.constant dense<0.000000e+00> : vector<16xf32>
    %362 = vector.multi_reduction <add>, %357, %cst_166 [1] : vector<16x32xf32> to vector<16xf32>
    %363 = vector.shape_cast %362 : vector<16xf32> to vector<16x1xf32>
    %cst_167 = arith.constant 3.200000e+01 : f32
    %364 = vector.broadcast %cst_167 : f32 to vector<16x1xf32>
    %365 = arith.divf %363, %364 : vector<16x1xf32>
    %366 = vector.broadcast %365 : vector<16x1xf32> to vector<16x32xf32>
    %367 = arith.subf %357, %366 : vector<16x32xf32>
    %368 = arith.mulf %367, %367 : vector<16x32xf32>
    %cst_168 = arith.constant dense<0.000000e+00> : vector<16xf32>
    %369 = vector.multi_reduction <add>, %368, %cst_168 [1] : vector<16x32xf32> to vector<16xf32>
    %370 = vector.shape_cast %369 : vector<16xf32> to vector<16x1xf32>
    %cst_169 = arith.constant 3.200000e+01 : f32
    %371 = vector.broadcast %cst_169 : f32 to vector<16x1xf32>
    %372 = arith.divf %370, %371 : vector<16x1xf32>
    %373 = vector.broadcast %365 : vector<16x1xf32> to vector<16x32xf32>
    %374 = arith.subf %357, %373 : vector<16x32xf32>
    %cst_170 = arith.constant 9.99999974E-6 : f32
    %375 = vector.broadcast %cst_170 : f32 to vector<16x1xf32>
    %376 = arith.addf %372, %375 : vector<16x1xf32>
    %377 = math.rsqrt %376 : vector<16x1xf32>
    %378 = vector.broadcast %377 : vector<16x1xf32> to vector<16x32xf32>
    %379 = arith.mulf %374, %378 : vector<16x32xf32>
    %380 = vector.broadcast %359 : vector<1x32xf32> to vector<16x32xf32>
    %381 = arith.mulf %379, %380 : vector<16x32xf32>
    %382 = vector.broadcast %361 : vector<1x32xf32> to vector<16x32xf32>
    %383 = arith.addf %381, %382 : vector<16x32xf32>
    %c0_171 = arith.constant 0 : index
    %c0_172 = arith.constant 0 : index
    %384 = vector.load %arg14[%c0_171, %c0_172] : memref<16x32xf32, #tpu.memory_space<vmem>>, vector<16x32xf32>
    tpu.vector_store %arg14[%c0_171, %c0_172], %383 {strides = array<i32>} : memref<16x32xf32, #tpu.memory_space<vmem>>, vector<16x32xf32>,
    return
  }
}

</mosaic_0001>

<bundles_post_ra>
// kernel: tpu_custom_call.1
= control target key start
LH: loop header
LB: loop body
LE: loop exit
PB: predicated region body
PF: predicated region fallthrough
CT: control target
= control target key end

     0   :  { %19 = vsyncpa [#allocation3], 0  ;;  %s3051_s0 = inlined_call_operand.hbm [shape: f32[16,16], index: 0, kind: input, shape index: {}]   ;;  %s3052_s1 = inlined_call_operand.hbm [shape: f32[16,32], index: 1, kind: input, shape index: {}]   ;;  %s3053_s2 = inlined_call_operand.vmem [shape: f32[2,32,96], index: 2, kind: input, shape index: {}]   ;;  %s3054_s3 = inlined_call_operand.vmem [shape: f32[2,1,96], index: 3, kind: input, shape index: {}]   ;;  %s3055_s4 = inlined_call_operand.vmem [shape: f32[2,32,32], index: 4, kind: input, shape index: {}]   ;;  %s3056_s5 = inlined_call_operand.hbm [shape: f32[2,1,32], index: 5, kind: input, shape index: {}]   ;;  %s3057_s6 = inlined_call_operand.vmem [shape: f32[2,32,64], index: 6, kind: input, shape index: {}]   ;;  %s3058_s7 = inlined_call_operand.vmem [shape: f32[2,1,64], index: 7, kind: input, shape index: {}]   ;;  %s3059_s8 = inlined_call_operand.vmem [shape: f32[2,64,32], index: 8, kind: input, shape index: {}]   ;;  %s3060_s9 = inlined_call_operand.vmem [shape: f32[2,1,32], index: 9, kind: input, shape index: {}]   ;;  %s3061_s10 = inlined_call_operand.vmem [shape: f32[2,1,32], index: 10, kind: input, shape index: {}]   ;;  %s3062_s11 = inlined_call_operand.hbm [shape: f32[2,1,32], index: 11, kind: input, shape index: {}]   ;;  %s3063_s12 = inlined_call_operand.vmem [shape: f32[2,1,32], index: 12, kind: input, shape index: {}]   ;;  %s3064_s13 = inlined_call_operand.hbm [shape: f32[2,1,32], index: 13, kind: input, shape index: {}]   ;;  %s3065_s14 = inlined_call_operand.hbm [shape: f32[16,32], index: 14, kind: output, shape index: {}]  }
   0x1   :  { %20 = vsyncpa [#allocation6], 0 }
   0x2   :  { %21 = vsyncpa [#allocation9], 0 }
   0x3   :  { %22 = vsyncpa [#allocation4], 0  ;;  %s40_s15 = sshll.u32 %s3052_s1, 4  ;;  %s2357_s16 = smov [#allocation5]   ;;  %s41_s15 = int_to_ptr.hbm [resolvable:$true] %s40_s15 }
   0x4   :  { %s42_s17 = sshll.u32 %s2357_s16, 4  ;;  %s3066_s18 = smov 128   ;;  %s43_s17 = int_to_ptr.vmem [resolvable:$true] %s42_s17 }
   0x5   :  { %s2359_s19 = smov 8   ;;  %s82_s22 = sshll.u32 %s3062_s11, 4  ;;  %s83_s22 = int_to_ptr.hbm [resolvable:$true] %s82_s22 }
   0x6   :  { %48 = dma.hbm_to_vmem [thread:$0]  %s41_s15, 256, %s43_s17, [#allocation6], %s3066_s18, %s3066_s18, %s2359_s19  }
   0x7   :  { %s2360_s23 = smov [#allocation8]   ;;  %s27_s1 = sshll.u32 %s3051_s0, 4  ;;  %s28_s1 = int_to_ptr.hbm [resolvable:$true] %s27_s1 }
   0x8   :  { %s84_s24 = sshll.u32 %s2360_s23, 4  ;;  %s3067_s27 = smov 16   ;;  %s85_s24 = int_to_ptr.vmem [resolvable:$true] %s84_s24 }
   0x9   :  { %s2362_s28 = smov 1   ;;  %s59_s15 = sshll.u32 %s3056_s5, 4  ;;  %s60_s15 = int_to_ptr.hbm [resolvable:$true] %s59_s15 }
   0xa   :  { %90 = dma.hbm_to_vmem [thread:$0]  %s83_s22, 32, %s85_s24, [#allocation9], %s3067_s27, %s3067_s27, %s2362_s28  }
   0xb   :  { %s2363_s16 = smov [#allocation2]   ;;  %s2364_s0 = smov [#allocation7]  }
   0xc   :  { %s29_s11 = sshll.u32 %s2363_s16, 4  ;;  %s61_s17 = sshll.u32 %s2364_s0, 4  ;;  %s30_s11 = int_to_ptr.vmem [resolvable:$true] %s29_s11  ;;  %s62_s17 = int_to_ptr.vmem [resolvable:$true] %s61_s17 }
   0xd   :  { %35 = dma.hbm_to_vmem [thread:$0]  %s28_s1, 256, %s30_s11, [#allocation3], %s3066_s18, %s3066_s18, %s2359_s19  }
   0xe   :  { %s97_s23 = sshll.u32 %s3064_s13, 4  ;;  %s2365_s5 = smov [#allocation10]   ;;  %s98_s23 = int_to_ptr.hbm [resolvable:$true] %s97_s23 }
   0xf   :  { %67 = dma.hbm_to_vmem [thread:$0]  %s60_s15, 32, %s62_s17, [#allocation6], %s3067_s27, %s3067_s27, %s2362_s28  }
  0x10   :  { %s99_s22 = sshll.u32 %s2365_s5, 4  ;;  %s100_s22 = int_to_ptr.vmem [resolvable:$true] %s99_s22 }
  0x11   :  { %105 = dma.hbm_to_vmem [thread:$0]  %s98_s23, 32, %s100_s22, [#allocation9], %s3067_s27, %s3067_s27, %s2362_s28  }
  0x12   :  { %2349 = dma.done.wait [#allocation3], 256  }
  0x13   :  { %2350 = vsyncadd [#allocation3], 4294967040 }
  0x14   :  { %2351 = dma.done.wait [#allocation6], 288  }
  0x15   :  { %2352 = vsyncadd [#allocation6], 4294967008 }
  0x16   :  { %2353 = dma.done.wait [#allocation9], 64  }
  0x17   :  { %2354 = vsyncadd [#allocation9], 4294967232  ;;  %v133_v0 = vld [vmem:[%s3053_s2 + $0x18] sm:$0xff]  ;;  %v132_v1 = vld [vmem:[%s3053_s2 + $0x10] sm:$0xff]  ;;  %vm138_vm0 = vcmask 261120   ;;  %s2366_s11 = smov 120  }
  0x18   :  { %157 = vmatpush.msra.mxu0 %v133_v0  ;;  %v131_v2 = vld [vmem:[%s3053_s2 + $0x8] sm:$0xff]  ;;  %v130_v3 = vld [vmem:[%s3053_s2] sm:$0xff]  ;;  %v2494_v4 = vld [vmem:[#allocation5] sm:$0xff]  ;;  %s2367_s0 = smov 88   ;;  %s2368_s17 = smov 96   ;;  %vm174_vm1 = vcmask 64512  }
  0x19   :  { %v2498_v5 = vld [vmem:[#allocation5 + $0x8] sm:$0xff]  ;;  %v2089_v6 = vld [vmem:[%s3054_s3] ss:$0 sm:$0xff]  ;;  %s2369_s20 = smov 104   ;;  %s2370_s21 = smov 72   ;;  %vm210_vm2 = vcmask 130048  }
  0x1a   :  { %158 = vmatpush.msra.mxu0 %v132_v1  ;;  %s2371_s23 = smov 80   ;;  %s2372_s5 = smov 112   ;;  %v128_v26 = vld [vmem:[#allocation2] sm:$0xff]  ;;  %v129_v33 = vld [vmem:[#allocation2 + $0x8] sm:$0xff] }
  0x1b   :  { %s2373_s22 = smov 56   ;;  %s2374_s24 = smov 64  }
  0x1c   :  { %159 = vmatpush.msra.mxu0 %v131_v2  ;;  %s2375_s25 = smov 48   ;;  %s2376_s13 = smov 40  }
  0x1d   :  { %s2377_s26 = smov 24   ;;  %s1922_s29 = sshll.u32 %s3065_s14, 4  ;;  %s1923_s29 = int_to_ptr.hbm [resolvable:$true] %s1922_s29 }
  0x1e   :  { %160 = vmatpush.msra.mxu0 %v130_v3 }
  0x1f   :  { %1937 = vmatmul.msk.f32.vlgmr.msra.gmra.mxu0 %vm138_vm0, %v2494_v4 }
  0x27   :  { %1938 = vmatmul.msk.f32.gmra.mxu0 %vm138_vm0, %v2498_v5 }
  0x9c   :  { %v162_v7 = vpop.f32.mrf.mxu0 }
  0x9d   :  { %v2505_v8 = vadd.f32 %v2089_v6, %v162_v7 }
  0x9f   :  { %294 = vrot.lane.b32.xlu2 %v2505_v8, %s2366_s11 }
  0xa4   :  { %v165_v9 = vpop.f32.mrf.mxu0 }
  0xa5   :  { %v2509_v10 = vadd.f32 %v2089_v6, %v165_v9 }
  0xa7   :  { %300 = vrot.lane.b32.xlu1 %v2509_v10, %s2367_s0  ;;  %172 = vrot.lane.b32.xlu0 %v2509_v10, %s2368_s17  ;;  %v2568_v59 = vpack.i.bf16 %v2505_v8, %v2509_v10 }
  0xa8   :  { %296 = vrot.lane.b32.xlu2 %v2509_v10, %s2366_s11 }
  0xaf   :  { %298 = vrot.lane.b32.xlu1 %v2505_v8, %s2367_s0  ;;  %170 = vrot.lane.b32.xlu0 %v2505_v8, %s2368_s17 }
  0xb0   :  { %546 = vrot.lane.b32.xlu2 %v2505_v8, %s2369_s20 }
  0xb7   :  { %550 = vrot.lane.b32.xlu1 %v2505_v8, %s2370_s21  ;;  %552 = vrot.lane.b32.xlu0 %v2509_v10, %s2370_s21 }
  0xb8   :  { %548 = vrot.lane.b32.xlu2 %v2509_v10, %s2369_s20 }
  0xbf   :  { %424 = vrot.lane.b32.xlu1 %v2505_v8, %s2371_s23  ;;  %426 = vrot.lane.b32.xlu0 %v2509_v10, %s2371_s23 }
  0xc7   :  { %422 = vrot.lane.b32.xlu1 %v2509_v10, %s2372_s5  ;;  %420 = vrot.lane.b32.xlu0 %v2505_v8, %s2372_s5 }
  0xf9   :  { %v295_v13 = vpop.permute.xlu2 %294 }
 0x102   :  { %v297_v16 = vpop.permute.xlu2 %296 }
 0x10a   :  { %v547_v20 = vpop.permute.xlu2 %546 }
 0x112   :  { %v549_v23 = vpop.permute.xlu2 %548 }
 0x119   :  { %v301_v11 = vpop.permute.xlu1 %300  ;;  %v173_v12 = vpop.permute.xlu0 %172 }
 0x11a   :  { %1939 = vmatpush.xpose.msk.msra.mxu1 %vm174_vm1, %v173_v12  ;;  %1945 = vmatpush.xpose.msk.msra.mxu3 %vm174_vm1, %v301_v11 }
 0x121   :  { %v299_v14 = vpop.permute.xlu1 %298  ;;  %v171_v15 = vpop.permute.xlu0 %170 }
 0x122   :  { %1940 = vmatpush.xpose.msk.msra.mxu1 %vm174_vm1, %v171_v15  ;;  %1946 = vmatpush.xpose.msk.msra.mxu3 %vm174_vm1, %v299_v14 }
 0x125   :  { %1941 = vmatmul.msk.f32.vlgmr.msra.gmra.mxu1 %vm174_vm1, %v2505_v8  ;;  %1947 = vmatmul.msk.f32.vlgmr.msra.gmra.mxu3 %vm174_vm1, %v295_v13 }
 0x129   :  { %v553_v17 = vpop.permute.xlu0 %552  ;;  %v551_v18 = vpop.permute.xlu1 %550 }
 0x12a   :  { %1957 = vmatpush.xpose.msk.msrb.mxu3 %vm174_vm1, %v553_v17 }
 0x12d   :  { %1942 = vmatmul.msk.f32.gmra.mxu1 %vm174_vm1, %v2509_v10  ;;  %1948 = vmatmul.msk.f32.gmra.mxu3 %vm174_vm1, %v297_v16 }
 0x12e   :  { %1958 = vmatpush.xpose.msk.msrb.mxu3 %vm174_vm1, %v551_v18 }
 0x131   :  { %v427_v19 = vpop.permute.xlu0 %426  ;;  %v425_v21 = vpop.permute.xlu1 %424 }
 0x132   :  { %1951 = vmatpush.xpose.msk.msrb.mxu0 %vm174_vm1, %v427_v19 }
 0x135   :  { %1959 = vmatmul.msk.f32.vlgmr.msrb.gmra.mxu3 %vm174_vm1, %v547_v20 }
 0x136   :  { %1952 = vmatpush.xpose.msk.msrb.mxu0 %vm174_vm1, %v425_v21 }
 0x139   :  { %v421_v22 = vpop.permute.xlu0 %420  ;;  %v423_v24 = vpop.permute.xlu1 %422 }
 0x13a   :  { %1953 = vmatmul.msk.f32.vlgmr.msrb.gmra.mxu0 %vm174_vm1, %v421_v22 }
 0x13d   :  { %1960 = vmatmul.msk.f32.gmra.mxu3 %vm174_vm1, %v549_v23 }
 0x142   :  { %1954 = vmatmul.msk.f32.gmra.mxu0 %vm174_vm1, %v423_v24 }
 0x1a2   :  { %v200_v25 = vpop.f32.mrf.mxu1 }
 0x1a3   :  { %v206_v27 = vmul.f32 0.35355338, %v200_v25 }
 0x1a5   :  { %v208_v28 = vadd.f32 %v206_v27, %v128_v26 }
 0x1a7   :  { %v211_v29 = vsel %vm210_vm2, %v208_v28, -inf }
 0x1a8   :  { %v327_v30 = vpop.f32.mrf.mxu3  ;;  %212 = vmax.xlane.f32.xlu2 %v211_v29 }
 0x1a9   :  { %v333_v31 = vmul.f32 0.35355338, %v327_v30 }
 0x1aa   :  { %v203_v32 = vpop.f32.mrf.mxu1 }
 0x1ab   :  { %v207_v34 = vmul.f32 0.35355338, %v203_v32  ;;  %v335_v35 = vadd.f32 %v333_v31, %v128_v26 }
 0x1ad   :  { %v337_v36 = vsel %vm210_vm2, %v335_v35, -inf  ;;  %v209_v37 = vadd.f32 %v207_v34, %v129_v33 }
 0x1ae   :  { %338 = vmax.xlane.f32.xlu1 %v337_v36 }
 0x1af   :  { %v214_v38 = vsel %vm210_vm2, %v209_v37, -inf }
 0x1b0   :  { %v330_v39 = vpop.f32.mrf.mxu3  ;;  %215 = vmax.xlane.f32.xlu0 %v214_v38 }
 0x1b1   :  { %v334_v51 = vmul.f32 0.35355338, %v330_v39 }
 0x1b3   :  { %v336_v54 = vadd.f32 %v334_v51, %v129_v33 }
 0x1b5   :  { %v340_v56 = vsel %vm210_vm2, %v336_v54, -inf }
 0x1b7   :  { %v453_v40 = vpop.f32.mrf.mxu0 }
 0x1b8   :  { %v459_v41 = vmul.f32 0.35355338, %v453_v40  ;;  %v579_v42 = vpop.f32.mrf.mxu3 }
 0x1b9   :  { %v585_v55 = vmul.f32 0.35355338, %v579_v42 }
 0x1ba   :  { %v461_v43 = vadd.f32 %v459_v41, %v128_v26 }
 0x1bb   :  { %v587_v57 = vadd.f32 %v585_v55, %v128_v26 }
 0x1bc   :  { %v463_v44 = vsel %vm210_vm2, %v461_v43, -inf }
 0x1bd   :  { %464 = vmax.xlane.f32.xlu0 %v463_v44  ;;  %v589_v58 = vsel %vm210_vm2, %v587_v57, -inf }
 0x1bf   :  { %v456_v45 = vpop.f32.mrf.mxu0 }
 0x1c0   :  { %v460_v46 = vmul.f32 0.35355338, %v456_v45  ;;  %v582_v47 = vpop.f32.mrf.mxu3 }
 0x1c1   :  { %v586_v48 = vmul.f32 0.35355338, %v582_v47 }
 0x1c2   :  { %v462_v49 = vadd.f32 %v460_v46, %v129_v33 }
 0x1c3   :  { %v2559_v50 = vadd.f32 %v586_v48, %v129_v33 }
 0x1c4   :  { %v466_v52 = vsel %vm210_vm2, %v462_v49, -inf }
 0x1c5   :  { %467 = vmax.xlane.f32.xlu2 %v466_v52  ;;  %v592_v53 = vsel %vm210_vm2, %v2559_v50, -inf }
 0x1c6   :  { %593 = vmax.xlane.f32.xlu1 %v592_v53 }
 0x1cd   :  { %341 = vmax.xlane.f32.xlu2 %v340_v56 }
 0x1d5   :  { %590 = vmax.xlane.f32.xlu2 %v589_v58 }
 0x1df   :  { %2055 = vrot.lane.b32.xlu1 %v2568_v59, %s2373_s22 }
 0x21b   :  { %v213_v60 = vpop.xlane.xlu2 %212 }
 0x21c   :  { %v217_v61 = vsub.f32 %v208_v28, %v213_v60 }
 0x21e   :  { %v219_v62 = vmul.f32 1.442695, %v217_v61 }
 0x220   :  { %2105 = vpow2.f32 %v219_v62 }
 0x221   :  { %v339_v8 = vpop.xlane.xlu1 %338 }
 0x222   :  { %v343_v11 = vsub.f32 %v335_v35, %v339_v8 }
 0x223   :  { %v216_v63 = vpop.xlane.xlu0 %215 }
 0x224   :  { %v218_v0 = vsub.f32 %v209_v37, %v216_v63  ;;  %v345_v13 = vmul.f32 1.442695, %v343_v11 }
 0x226   :  { %v2572_v1 = vpop.eup %2105  ;;  %v221_v2 = vmul.f32 1.442695, %v218_v0 }
 0x227   :  { %v223_v3 = vsel %vm210_vm2, %v2572_v1, 0.0 }
 0x228   :  { %2107 = vpow2.f32 %v221_v2  ;;  %224 = vadd.xlane.f32.xlu0 %v223_v3 }
 0x22e   :  { %v2576_v6 = vpop.eup %2107 }
 0x22f   :  { %v226_v7 = vsel %vm210_vm2, %v2576_v6, 0.0 }
 0x230   :  { %227 = vadd.xlane.f32.xlu1 %v226_v7  ;;  %v465_v9 = vpop.xlane.xlu0 %464 }
 0x231   :  { %v469_v10 = vsub.f32 %v461_v43, %v465_v9 }
 0x233   :  { %v471_v12 = vmul.f32 1.442695, %v469_v10 }
 0x235   :  { %2109 = vpow2.f32 %v471_v12 }
 0x236   :  { %2111 = vpow2.f32 %v345_v13 }
 0x238   :  { %v468_v14 = vpop.xlane.xlu2 %467 }
 0x239   :  { %v470_v25 = vsub.f32 %v462_v49, %v468_v14  ;;  %v594_v29 = vpop.xlane.xlu1 %593 }
 0x23a   :  { %v596_v31 = vsub.f32 %v2559_v50, %v594_v29 }
 0x23b   :  { %v2580_v15 = vpop.eup %2109  ;;  %v473_v28 = vmul.f32 1.442695, %v470_v25 }
 0x23c   :  { %2050 = vrot.lane.b32.xlu0 %v2568_v59, %s2374_s24  ;;  %v475_v16 = vsel %vm210_vm2, %v2580_v15, 0.0  ;;  %v2586_v18 = vpop.eup %2111  ;;  %v599_v33 = vmul.f32 1.442695, %v596_v31 }
 0x23d   :  { %476 = vadd.xlane.f32.xlu2 %v475_v16  ;;  %v349_v21 = vsel %vm210_vm2, %v2586_v18, 0.0 }
 0x240   :  { %v342_v17 = vpop.xlane.xlu2 %341 }
 0x241   :  { %v344_v19 = vsub.f32 %v336_v54, %v342_v17 }
 0x243   :  { %v347_v20 = vmul.f32 1.442695, %v344_v19 }
 0x245   :  { %2113 = vpow2.f32 %v347_v20  ;;  %350 = vadd.xlane.f32.xlu2 %v349_v21 }
 0x248   :  { %v591_v22 = vpop.xlane.xlu2 %590 }
 0x249   :  { %v595_v23 = vsub.f32 %v587_v57, %v591_v22 }
 0x24b   :  { %v2590_v24 = vpop.eup %2113  ;;  %v597_v26 = vmul.f32 1.442695, %v595_v23 }
 0x24c   :  { %v352_v27 = vsel %vm210_vm2, %v2590_v24, 0.0 }
 0x24d   :  { %2115 = vpow2.f32 %v597_v26  ;;  %353 = vadd.xlane.f32.xlu1 %v352_v27 }
 0x24e   :  { %2117 = vpow2.f32 %v473_v28 }
 0x24f   :  { %2119 = vpow2.f32 %v599_v33 }
 0x251   :  { %v2056_v38 = vpop.permute.xlu1 %2055 }
 0x252   :  { %v2057_v63 = vunpack.i.l.bf16 %v2056_v38  ;;  %v2058_v3 = vunpack.i.h.bf16 %v2056_v38 }
 0x253   :  { %v2594_v30 = vpop.eup %2115 }
 0x254   :  { %v601_v32 = vsel %vm210_vm2, %v2594_v30, 0.0  ;;  %v2599_v34 = vpop.eup %2117 }
 0x255   :  { %602 = vadd.xlane.f32.xlu2 %v601_v32  ;;  %v478_v35 = vsel %vm210_vm2, %v2599_v34, 0.0  ;;  %v2603_v36 = vpop.eup %2119 }
 0x256   :  { %v604_v37 = vsel %vm210_vm2, %v2603_v36, 0.0 }
 0x25d   :  { %479 = vadd.xlane.f32.xlu2 %v478_v35 }
 0x266   :  { %605 = vadd.xlane.f32.xlu0 %v604_v37  ;;  %2065 = vrot.lane.b32.xlu1 %v2568_v59, %s2375_s25 }
 0x275   :  { %2060 = vrot.lane.b32.xlu2 %v2568_v59, %s2376_s13 }
 0x29b   :  { %v225_v39 = vpop.xlane.xlu0 %224 }
 0x29c   :  { %2121 = vrcp.f32 %v225_v39  ;;  %v240_v45 = vand.u32 2147483648, %v225_v39  ;;  %vm234_vm4 = vweird.f32 %v225_v39  ;;  %v238_v48 = vand.u32 2147483647, %v225_v39 }
 0x29e   :  { %v241_v51 = vor.u32 1.1754944e-38, %v240_v45  ;;  %vm239_vm6 = vcmp.eq.f32.partialorder %v238_v48, 8.507059e+37 }
 0x2a2   :  { %v2122_v40 = vpop.eup %2121 }
 0x2a3   :  { %v230_v41 = vmul.f32 %v2122_v40, %v225_v39  ;;  %v228_v42 = vpop.xlane.xlu1 %227  ;;  %vm235_vm3 = vweird.f32 %v2122_v40 }
 0x2a4   :  { %2123 = vrcp.f32 %v228_v42  ;;  %vm236_vm5 = vmor %vm234_vm4, %vm235_vm3  ;;  %v255_v58 = vand.u32 2147483648, %v228_v42  ;;  %vm249_vm8 = vweird.f32 %v228_v42  ;;  %v253_v62 = vand.u32 2147483647, %v228_v42 }
 0x2a5   :  { %v231_v43 = vsub.f32 1.0, %v230_v41 }
 0x2a6   :  { %v256_v2 = vor.u32 1.1754944e-38, %v255_v58  ;;  %vm254_vm10 = vcmp.eq.f32.partialorder %v253_v62, 8.507059e+37 }
 0x2a7   :  { %v232_v44 = vmul.f32 %v2122_v40, %v231_v43 }
 0x2a9   :  { %v233_v46 = vadd.f32 %v2122_v40, %v232_v44 }
 0x2aa   :  { %v2124_v47 = vpop.eup %2123 }
 0x2ab   :  { %v245_v49 = vmul.f32 %v2124_v47, %v228_v42  ;;  %v237_v50 = vsel %vm236_vm5, %v2122_v40, %v233_v46  ;;  %vm250_vm7 = vweird.f32 %v2124_v47 }
 0x2ac   :  { %v242_v56 = vsel %vm239_vm6, %v241_v51, %v237_v50  ;;  %vm251_vm9 = vmor %vm249_vm8, %vm250_vm7 }
 0x2ad   :  { %v246_v52 = vsub.f32 1.0, %v245_v49  ;;  %v243_v60 = vmul.f32 %v2572_v1, %v242_v56 }
 0x2ae   :  { %v2051_v53 = vpop.permute.xlu0 %2050 }
 0x2af   :  { %v247_v54 = vmul.f32 %v2124_v47, %v246_v52  ;;  %v2052_v55 = vunpack.i.l.bf16 %v2051_v53  ;;  %v2053_v59 = vunpack.i.h.bf16 %v2051_v53 }
 0x2b0   :  { %v2611_v57 = vpop.xlane.xlu2 %476 }
 0x2b1   :  { %285 = vmatpush.msra.mxu2 %v2052_v55  ;;  %v248_v61 = vadd.f32 %v2124_v47, %v247_v54  ;;  %v492_v44 = vand.u32 2147483648, %v2611_v57  ;;  %vm486_vm7 = vweird.f32 %v2611_v57 }
 0x2b3   :  { %286 = vmatpush.msra.mxu2 %v2053_v59  ;;  %v252_v0 = vsel %vm251_vm9, %v2124_v47, %v248_v61  ;;  %v490_v47 = vand.u32 2147483647, %v2611_v57  ;;  %v493_v53 = vor.u32 1.1754944e-38, %v492_v44 }
 0x2b4   :  { %1943 = vmatmul.msk.f32.vlgmr.msra.gmra.mxu2 %vm210_vm2, %v243_v60  ;;  %v257_v7 = vsel %vm254_vm10, %v256_v2, %v252_v0 }
 0x2b5   :  { %411 = vmatpush.msrb.mxu2 %v2057_v63  ;;  %v258_v9 = vmul.f32 %v2576_v6, %v257_v7 }
 0x2b7   :  { %412 = vmatpush.msrb.mxu2 %v2058_v3 }
 0x2b8   :  { %v351_v8 = vpop.xlane.xlu2 %350 }
 0x2b9   :  { %2125 = vrcp.f32 %v351_v8  ;;  %v366_v16 = vand.u32 2147483648, %v351_v8  ;;  %v364_v19 = vand.u32 2147483647, %v351_v8  ;;  %vm360_vm12 = vweird.f32 %v351_v8 }
 0x2ba   :  { %2127 = vrcp.f32 %v2611_v57 }
 0x2bb   :  { %v367_v21 = vor.u32 1.1754944e-38, %v366_v16  ;;  %vm365_vm14 = vcmp.eq.f32.partialorder %v364_v19, 8.507059e+37 }
 0x2bc   :  { %1944 = vmatmul.msk.f32.gmra.mxu2 %vm210_vm2, %v258_v9 }
 0x2bf   :  { %v2126_v1 = vpop.eup %2125 }
 0x2c0   :  { %v356_v10 = vmul.f32 %v2126_v1, %v351_v8  ;;  %v354_v11 = vpop.xlane.xlu1 %353  ;;  %v2618_v12 = vpop.eup %2127  ;;  %vm361_vm11 = vweird.f32 %v2126_v1 }
 0x2c1   :  { %2129 = vrcp.f32 %v354_v11  ;;  %v482_v17 = vmul.f32 %v2618_v12, %v2611_v57  ;;  %vm362_vm13 = vmor %vm360_vm12, %vm361_vm11  ;;  %v381_v29 = vand.u32 2147483648, %v354_v11  ;;  %v379_v33 = vand.u32 2147483647, %v354_v11 }
 0x2c2   :  { %v357_v13 = vsub.f32 1.0, %v356_v10  ;;  %vm375_vm3 = vweird.f32 %v354_v11  ;;  %vm487_vm6 = vweird.f32 %v2618_v12  ;;  %vm491_vm11 = vcmp.eq.f32.partialorder %v490_v47, 8.507059e+37 }
 0x2c3   :  { %v483_v26 = vsub.f32 1.0, %v482_v17  ;;  %v382_v39 = vor.u32 1.1754944e-38, %v381_v29  ;;  %vm380_vm5 = vcmp.eq.f32.partialorder %v379_v33, 8.507059e+37  ;;  %vm2631_vm8 = vmor %vm486_vm7, %vm487_vm6 }
 0x2c4   :  { %v358_v14 = vmul.f32 %v2126_v1, %v357_v13 }
 0x2c5   :  { %v484_v35 = vmul.f32 %v2618_v12, %v483_v26 }
 0x2c6   :  { %v359_v20 = vadd.f32 %v2126_v1, %v358_v14 }
 0x2c7   :  { %v2130_v6 = vpop.eup %2129  ;;  %v485_v43 = vadd.f32 %v2618_v12, %v484_v35 }
 0x2c8   :  { %v371_v22 = vmul.f32 %v2130_v6, %v354_v11  ;;  %v603_v23 = vpop.xlane.xlu2 %602  ;;  %v363_v25 = vsel %vm362_vm13, %v2126_v1, %v359_v20  ;;  %vm376_vm15 = vweird.f32 %v2130_v6 }
 0x2c9   :  { %2131 = vrcp.f32 %v603_v23  ;;  %v368_v28 = vsel %vm365_vm14, %v367_v21, %v363_v25  ;;  %vm377_vm4 = vmor %vm375_vm3, %vm376_vm15  ;;  %v618_v48 = vand.u32 2147483648, %v603_v23  ;;  %v616_v51 = vand.u32 2147483647, %v603_v23 }
 0x2ca   :  { %v372_v27 = vsub.f32 1.0, %v371_v22  ;;  %v369_v31 = vmul.f32 %v2586_v18, %v368_v28  ;;  %v489_v52 = vsel %vm2631_vm8, %v2618_v12, %v485_v43  ;;  %vm612_vm10 = vweird.f32 %v603_v23 }
 0x2cb   :  { %v619_v55 = vor.u32 1.1754944e-38, %v618_v48  ;;  %vm617_vm13 = vcmp.eq.f32.partialorder %v616_v51, 8.507059e+37  ;;  %v494_v60 = vsel %vm491_vm11, %v493_v53, %v489_v52  ;;  %v2090_v52 = vld [vmem:[#allocation7] ss:$0 sm:$0xff] }
 0x2cc   :  { %v373_v32 = vmul.f32 %v2130_v6, %v372_v27  ;;  %1949 = vmatmul.msk.f32.vlgmr.msrb.gmra.mxu2 %vm210_vm2, %v369_v31  ;;  %v495_v9 = vmul.f32 %v2580_v15, %v494_v60  ;;  %v2378_v60 = vmov 32.0  }
 0x2ce   :  { %v374_v37 = vadd.f32 %v2130_v6, %v373_v32 }
 0x2cf   :  { %v2132_v38 = vpop.eup %2131 }
 0x2d0   :  { %v608_v40 = vmul.f32 %v2132_v38, %v603_v23  ;;  %v480_v41 = vpop.xlane.xlu2 %479  ;;  %v378_v42 = vsel %vm377_vm4, %v2130_v6, %v374_v37  ;;  %vm613_vm9 = vweird.f32 %v2132_v38  ;;  %v706_v37 = vld [vmem:[%s3055_s4 + $0x18] sm:$0xff] }
 0x2d1   :  { %2133 = vrcp.f32 %v480_v41  ;;  %v383_v18 = vsel %vm380_vm5, %v382_v39, %v378_v42  ;;  %vm614_vm12 = vmor %vm612_vm10, %vm613_vm9  ;;  %v507_v3 = vand.u32 2147483648, %v480_v41  ;;  %v505_v11 = vand.u32 2147483647, %v480_v41  ;;  %729 = vmatpush.msra.mxu0 %v706_v37  ;;  %v704_v39 = vld [vmem:[%s3055_s4 + $0x8] sm:$0xff]  ;;  %v2092_v37 = vld [vmem:[#allocation8] ss:$0 sm:$0xff] }
 0x2d2   :  { %v609_v45 = vsub.f32 1.0, %v608_v40  ;;  %v384_v46 = vmul.f32 %v2590_v24, %v383_v18  ;;  %vm501_vm15 = vweird.f32 %v480_v41  ;;  %v703_v40 = vld [vmem:[%s3055_s4] sm:$0xff]  ;;  %vm700_vm9 = vcmask 195584  }
 0x2d3   :  { %v508_v13 = vor.u32 1.1754944e-38, %v507_v3  ;;  %vm506_vm4 = vcmp.eq.f32.partialorder %v505_v11, 8.507059e+37 }
 0x2d4   :  { %v610_v50 = vmul.f32 %v2132_v38, %v609_v45  ;;  %1950 = vmatmul.msk.f32.gmra.mxu2 %vm210_vm2, %v384_v46 }
 0x2d6   :  { %v611_v24 = vadd.f32 %v2132_v38, %v610_v50 }
 0x2d7   :  { %v2134_v54 = vpop.eup %2133 }
 0x2d8   :  { %v615_v56 = vsel %vm614_vm12, %v2132_v38, %v611_v24  ;;  %v497_v57 = vmul.f32 %v2134_v54, %v480_v41  ;;  %v2066_v58 = vpop.permute.xlu1 %2065  ;;  %v2061_v59 = vpop.permute.xlu2 %2060  ;;  %vm502_vm14 = vweird.f32 %v2134_v54  ;;  %v705_v38 = vld [vmem:[%s3055_s4 + $0x10] sm:$0xff] }
 0x2d9   :  { %v620_v61 = vsel %vm617_vm13, %v619_v55, %v615_v56  ;;  %v2062_v62 = vunpack.i.l.bf16 %v2061_v59  ;;  %v606_v63 = vpop.xlane.xlu0 %605  ;;  %v2067_v0 = vunpack.i.l.bf16 %v2066_v58  ;;  %v2063_v7 = vunpack.i.h.bf16 %v2061_v59  ;;  %vm503_vm3 = vmor %vm501_vm15, %vm502_vm14  ;;  %730 = vmatpush.msra.mxu0 %v705_v38 }
 0x2da   :  { %v498_v2 = vsub.f32 1.0, %v497_v57  ;;  %2135 = vrcp.f32 %v606_v63  ;;  %v2068_v8 = vunpack.i.h.bf16 %v2066_v58  ;;  %v621_v10 = vmul.f32 %v2594_v30, %v620_v61 }
 0x2db   :  { %537 = vmatpush.msrb.mxu1 %v2067_v0  ;;  %663 = vmatpush.msra.mxu2 %v2062_v62  ;;  %v633_v20 = vand.u32 2147483648, %v606_v63  ;;  %v631_v21 = vand.u32 2147483647, %v606_v63  ;;  %vm627_vm6 = vweird.f32 %v606_v63  ;;  %2137 = vrcp.f32 %v2378_v60 }
 0x2dc   :  { %v499_v1 = vmul.f32 %v2134_v54, %v498_v2  ;;  %731 = vmatpush.msra.mxu0 %v704_v39 }
 0x2dd   :  { %538 = vmatpush.msrb.mxu1 %v2068_v8  ;;  %664 = vmatpush.msra.mxu2 %v2063_v7  ;;  %v634_v23 = vor.u32 1.1754944e-38, %v633_v20  ;;  %vm632_vm8 = vcmp.eq.f32.partialorder %v631_v21, 8.507059e+37 }
 0x2de   :  { %1955 = vmatmul.msk.f32.vlgmr.msrb.gmra.mxu1 %vm210_vm2, %v495_v9  ;;  %1961 = vmatmul.msk.f32.vlgmr.msra.gmra.mxu2 %vm210_vm2, %v621_v10  ;;  %v500_v12 = vadd.f32 %v2134_v54, %v499_v1 }
 0x2df   :  { %732 = vmatpush.msra.mxu0 %v703_v40 }
 0x2e0   :  { %v2136_v14 = vpop.eup %2135  ;;  %v504_v16 = vsel %vm503_vm3, %v2134_v54, %v500_v12 }
 0x2e1   :  { %v623_v17 = vmul.f32 %v2136_v14, %v606_v63  ;;  %v509_v15 = vsel %vm506_vm4, %v508_v13, %v504_v16  ;;  %vm628_vm5 = vweird.f32 %v2136_v14  ;;  %v2138_v61 = vpop.eup %2137  ;;  %v807_v16 = vld [vmem:[%s3057_s6 + $0x10] sm:$0xff] }
 0x2e2   :  { %v510_v30 = vmul.f32 %v2599_v34, %v509_v15  ;;  %vm629_vm7 = vmor %vm627_vm6, %vm628_vm5  ;;  %v751_v62 = vmul.f32 32.0, %v2138_v61  ;;  %vm755_vm10 = vweird.f32 %v2138_v61  ;;  %v805_v15 = vld [vmem:[%s3057_s6] sm:$0xff] }
 0x2e3   :  { %v624_v19 = vsub.f32 1.0, %v623_v17  ;;  %v806_v17 = vld [vmem:[%s3057_s6 + $0x8] sm:$0xff] }
 0x2e4   :  { %v752_v63 = vsub.f32 1.0, %v751_v62 }
 0x2e5   :  { %v625_v6 = vmul.f32 %v2136_v14, %v624_v19 }
 0x2e6   :  { %1956 = vmatmul.msk.f32.gmra.mxu1 %vm210_vm2, %v510_v30  ;;  %v753_v0 = vmul.f32 %v2138_v61, %v752_v63 }
 0x2e7   :  { %v626_v22 = vadd.f32 %v2136_v14, %v625_v6 }
 0x2e8   :  { %v754_v2 = vadd.f32 %v2138_v61, %v753_v0  ;;  %v925_v0 = vld [vmem:[%s3059_s8 + $0x18] sm:$0xff] }
 0x2e9   :  { %v630_v25 = vsel %vm629_vm7, %v2136_v14, %v626_v22  ;;  %v808_v14 = vld [vmem:[%s3057_s6 + $0x18] sm:$0xff] }
 0x2ea   :  { %v635_v26 = vsel %vm632_vm8, %v634_v23, %v630_v25  ;;  %v2677_v3 = vsel %vm755_vm10, %v2138_v61, %v754_v2  ;;  %831 = vmatpush.msra.mxu1 %v808_v14  ;;  %v926_v61 = vld [vmem:[%s3059_s8 + $0x20] sm:$0xff] }
 0x2eb   :  { %v636_v27 = vmul.f32 %v2603_v36, %v635_v26 }
 0x2ec   :  { %832 = vmatpush.msra.mxu1 %v807_v16 }
 0x2ed   :  { %1962 = vmatmul.msk.f32.gmra.mxu2 %vm210_vm2, %v636_v27 }
 0x2ee   :  { %833 = vmatpush.msra.mxu1 %v806_v17 }
 0x2f0   :  { %834 = vmatpush.msra.mxu1 %v805_v15 }
 0x337   :  { %v288_v28 = vpop.f32.mrf.mxu2 }
 0x33f   :  { %v291_v29 = vpop.f32.mrf.mxu2 }
 0x34f   :  { %v414_v31 = vpop.f32.mrf.mxu2 }
 0x357   :  { %v417_v34 = vpop.f32.mrf.mxu2 }
 0x35b   :  { %v540_v32 = vpop.f32.mrf.mxu1 }
 0x35c   :  { %682 = vrot.lane.b32.xlu1 %v540_v32, %s3067_s27  ;;  %v2091_v32 = vld [vmem:[%s3061_s10] ss:$0 sm:$0xff] }
 0x361   :  { %v666_v33 = vpop.f32.mrf.mxu2 }
 0x362   :  { %690 = vrot.lane.b32.xlu2 %v666_v33, %s2377_s26 }
 0x363   :  { %v543_v35 = vpop.f32.mrf.mxu1 }
 0x364   :  { %684 = vrot.lane.b32.xlu0 %v543_v35, %s3067_s27  ;;  %674 = vrot.lane.b32.xlu1 %v414_v31, %s2359_s19 }
 0x36c   :  { %676 = vrot.lane.b32.xlu1 %v417_v34, %s2359_s19 }
 0x370   :  { %v669_v36 = vpop.f32.mrf.mxu2 }
 0x371   :  { %692 = vrot.lane.b32.xlu2 %v669_v36, %s2377_s26 }
 0x3bc   :  { %v691_v18 = vpop.permute.xlu2 %690 }
 0x3cb   :  { %v693_v49 = vpop.permute.xlu2 %692 }
 0x3ce   :  { %v683_v41 = vpop.permute.xlu1 %682 }
 0x3d6   :  { %v675_v42 = vpop.permute.xlu1 %674  ;;  %v685_v47 = vpop.permute.xlu0 %684 }
 0x3d7   :  { %v696_v43 = vsel %vm174_vm1, %v288_v28, %v675_v42 }
 0x3d8   :  { %v698_v44 = vsel %vm210_vm2, %v696_v43, %v683_v41 }
 0x3d9   :  { %v701_v45 = vsel %vm700_vm9, %v698_v44, %v691_v18 }
 0x3da   :  { %1963 = vmatmul.msk.f32.vlgmr.msra.gmra.mxu0 %vm138_vm0, %v701_v45 }
 0x3de   :  { %v677_v46 = vpop.permute.xlu1 %676 }
 0x3df   :  { %v697_v48 = vsel %vm174_vm1, %v291_v29, %v677_v46  ;;  %v2093_v46 = vld [vmem:[%s3058_s7] ss:$0 sm:$0xff] }
 0x3e0   :  { %v699_v50 = vsel %vm210_vm2, %v697_v48, %v685_v47 }
 0x3e1   :  { %v702_v51 = vsel %vm700_vm9, %v699_v50, %v693_v49 }
 0x3e2   :  { %1964 = vmatmul.msk.f32.gmra.mxu0 %vm138_vm0, %v702_v51 }
 0x457   :  { %v734_v53 = vpop.f32.mrf.mxu0 }
 0x458   :  { %v735_v24 = vadd.f32 %v2090_v52, %v734_v53 }
 0x45a   :  { %v740_v54 = vadd.f32 %v735_v24, %v2494_v4 }
 0x45c   :  { %v744_v55 = vsel %vm138_vm0, %v740_v54, 0.0 }
 0x45d   :  { %745 = vadd.xlane.f32.xlu1 %v744_v55 }
 0x45f   :  { %v737_v56 = vpop.f32.mrf.mxu0 }
 0x460   :  { %v738_v57 = vadd.f32 %v2090_v52, %v737_v56  ;;  %v928_v56 = vld [vmem:[%s3059_s8 + $0x30] sm:$0xff] }
 0x462   :  { %v741_v58 = vadd.f32 %v738_v57, %v2498_v5 }
 0x464   :  { %v747_v59 = vsel %vm138_vm0, %v741_v58, 0.0 }
 0x465   :  { %748 = vadd.xlane.f32.xlu2 %v747_v59 }
 0x4d0   :  { %v746_v4 = vpop.xlane.xlu1 %745 }
 0x4d1   :  { %v757_v7 = vmul.f32 %v2677_v3, %v746_v4 }
 0x4d3   :  { %v759_v8 = vsub.f32 %v740_v54, %v757_v7  ;;  %v929_v54 = vld [vmem:[%s3059_s8 + $0x38] sm:$0xff]  ;;  %v924_v7 = vld [vmem:[%s3059_s8 + $0x10] sm:$0xff] }
 0x4d4   :  { %949 = vmatpush.msra.mxu3 %v929_v54 }
 0x4d5   :  { %v761_v9 = vmul.f32 %v759_v8, %v759_v8 }
 0x4d6   :  { %950 = vmatpush.msra.mxu3 %v928_v56 }
 0x4d7   :  { %v763_v5 = vsel %vm138_vm0, %v761_v9, 0.0 }
 0x4d8   :  { %764 = vadd.xlane.f32.xlu0 %v763_v5  ;;  %v749_v1 = vpop.xlane.xlu2 %748  ;;  %v923_v5 = vld [vmem:[%s3059_s8 + $0x8] sm:$0xff] }
 0x4d9   :  { %v758_v10 = vmul.f32 %v2677_v3, %v749_v1  ;;  %v922_v1 = vld [vmem:[%s3059_s8] sm:$0xff] }
 0x4db   :  { %v760_v11 = vsub.f32 %v741_v58, %v758_v10  ;;  %v927_v58 = vld [vmem:[%s3059_s8 + $0x28] sm:$0xff] }
 0x4dc   :  { %951 = vmatpush.msra.mxu3 %v927_v58 }
 0x4dd   :  { %v762_v12 = vmul.f32 %v760_v11, %v760_v11 }
 0x4de   :  { %952 = vmatpush.msra.mxu3 %v926_v61 }
 0x4df   :  { %v766_v13 = vsel %vm138_vm0, %v762_v12, 0.0 }
 0x4e0   :  { %767 = vadd.xlane.f32.xlu1 %v766_v13  ;;  %953 = vmatpush.msra.mxu3 %v925_v0 }
 0x4e2   :  { %954 = vmatpush.msra.mxu3 %v924_v7 }
 0x4e4   :  { %955 = vmatpush.msra.mxu3 %v923_v5 }
 0x4e6   :  { %956 = vmatpush.msra.mxu3 %v922_v1 }
 0x54b   :  { %v765_v19 = vpop.xlane.xlu0 %764 }
 0x54c   :  { %v769_v20 = vmul.f32 %v765_v19, %v2677_v3 }
 0x54e   :  { %v771_v30 = vadd.f32 1e-05, %v769_v20 }
 0x550   :  { %2139 = vrsqrt.f32 %v771_v30  ;;  %vm779_vm12 = vweird.f32 %v771_v30 }
 0x553   :  { %v768_v6 = vpop.xlane.xlu1 %767 }
 0x554   :  { %v770_v21 = vmul.f32 %v768_v6, %v2677_v3 }
 0x556   :  { %v2140_v22 = vpop.eup %2139  ;;  %v772_v23 = vadd.f32 1e-05, %v770_v21 }
 0x557   :  { %v774_v25 = vmul.f32 %v2140_v22, %v771_v30  ;;  %vm780_vm11 = vweird.f32 %v2140_v22 }
 0x558   :  { %2141 = vrsqrt.f32 %v772_v23  ;;  %vm781_vm13 = vmor %vm779_vm12, %vm780_vm11  ;;  %vm789_vm15 = vweird.f32 %v772_v23 }
 0x559   :  { %v775_v26 = vmul.f32 %v2140_v22, %v774_v25 }
 0x55b   :  { %v776_v27 = vmul.f32 0.5, %v775_v26 }
 0x55d   :  { %v777_v28 = vsub.f32 1.5, %v776_v27 }
 0x55e   :  { %v2142_v29 = vpop.eup %2141 }
 0x55f   :  { %v778_v31 = vmul.f32 %v2140_v22, %v777_v28  ;;  %v784_v34 = vmul.f32 %v2142_v29, %v772_v23  ;;  %vm790_vm14 = vweird.f32 %v2142_v29 }
 0x560   :  { %vm791_vm3 = vmor %vm789_vm15, %vm790_vm14  ;;  %vm934_vm14 = vcmask 523264  }
 0x561   :  { %v782_v33 = vsel %vm781_vm13, %v2140_v22, %v778_v31  ;;  %v785_v35 = vmul.f32 %v2142_v29, %v784_v34 }
 0x562   :  { %v793_v36 = vmul.f32 %v782_v33, %v759_v8 }
 0x563   :  { %v786_v38 = vmul.f32 0.5, %v785_v35 }
 0x564   :  { %v798_v39 = vmul.f32 %v2091_v32, %v793_v36 }
 0x565   :  { %v787_v40 = vsub.f32 1.5, %v786_v38 }
 0x566   :  { %v2700_v41 = vadd.f32 %v2092_v37, %v798_v39 }
 0x567   :  { %v788_v42 = vmul.f32 %v2142_v29, %v787_v40 }
 0x568   :  { %1965 = vmatmul.msk.f32.vlgmr.msra.gmra.mxu1 %vm138_vm0, %v2700_v41 }
 0x569   :  { %v792_v43 = vsel %vm791_vm3, %v2142_v29, %v788_v42 }
 0x56a   :  { %v794_v18 = vmul.f32 %v792_v43, %v760_v11 }
 0x56c   :  { %v799_v44 = vmul.f32 %v2091_v32, %v794_v18 }
 0x56e   :  { %v2704_v45 = vadd.f32 %v2092_v37, %v799_v44 }
 0x570   :  { %1966 = vmatmul.msk.f32.gmra.mxu1 %vm138_vm0, %v2704_v45 }
 0x5e5   :  { %v836_v47 = vpop.f32.mrf.mxu1 }
 0x5e6   :  { %v2711_v48 = vadd.f32 %v2093_v46, %v836_v47 }
 0x5e8   :  { %v2714_v49 = vmul.f32 0.70710677, %v2711_v48  ;;  %v842_v58 = vmul.f32 0.5, %v2711_v48  ;;  %v2094_v48 = vld [vmem:[%s3060_s9] ss:$0 sm:$0xff] }
 0x5ea   :  { %v846_v50 = vand.u32 2147483647, %v2714_v49  ;;  %vm912_vm13 = vcmp.ge.f32.partialorder %v2714_v49, 0.0 }
 0x5ec   :  { %v848_v51 = vmul.f32 0.3275911, %v846_v50  ;;  %v900_v16 = vsub.f32 0.0, %v846_v50 }
 0x5ed   :  { %v839_v52 = vpop.f32.mrf.mxu1 }
 0x5ee   :  { %v850_v53 = vadd.f32 1.0, %v848_v51  ;;  %v2717_v24 = vadd.f32 %v2093_v46, %v839_v52  ;;  %v902_v6 = vmul.f32 %v900_v16, %v846_v50 }
 0x5f0   :  { %2143 = vrcp.f32 %v850_v53  ;;  %v2723_v55 = vmul.f32 0.70710677, %v2717_v24  ;;  %v863_v4 = vand.u32 2147483648, %v850_v53  ;;  %v861_v9 = vand.u32 2147483647, %v850_v53 }
 0x5f1   :  { %vm857_vm5 = vweird.f32 %v850_v53  ;;  %v904_v28 = vmul.f32 1.442695, %v902_v6  ;;  %v1971_v6 = vld [vmem:[%s3053_s2 + $0x30] sm:$0xff] }
 0x5f2   :  { %v847_v57 = vand.u32 2147483647, %v2723_v55  ;;  %v864_v11 = vor.u32 1.1754944e-38, %v863_v4  ;;  %vm862_vm7 = vcmp.eq.f32.partialorder %v861_v9, 8.507059e+37  ;;  %vm913_vm15 = vcmp.ge.f32.partialorder %v2723_v55, 0.0 }
 0x5f3   :  { %v843_v4 = vmul.f32 0.5, %v2717_v24 }
 0x5f4   :  { %v849_v59 = vmul.f32 0.3275911, %v847_v57  ;;  %v901_v34 = vsub.f32 0.0, %v847_v57 }
 0x5f6   :  { %v2144_v60 = vpop.eup %2143  ;;  %v851_v63 = vadd.f32 1.0, %v849_v59  ;;  %v903_v38 = vmul.f32 %v901_v34, %v847_v57 }
 0x5f7   :  { %v853_v62 = vmul.f32 %v2144_v60, %v850_v53  ;;  %vm858_vm4 = vweird.f32 %v2144_v60 }
 0x5f8   :  { %2145 = vrcp.f32 %v851_v63  ;;  %vm859_vm6 = vmor %vm857_vm5, %vm858_vm4  ;;  %v878_v30 = vand.u32 2147483648, %v851_v63  ;;  %v876_v22 = vand.u32 2147483647, %v851_v63  ;;  %vm872_vm10 = vweird.f32 %v851_v63 }
 0x5f9   :  { %v854_v2 = vsub.f32 1.0, %v853_v62  ;;  %2147 = vpow2.f32 %v904_v28  ;;  %v906_v18 = vmul.f32 1.442695, %v903_v38  ;;  %v2095_v38 = vld [vmem:[%s3063_s12] ss:$0 sm:$0xff] }
 0x5fa   :  { %v879_v27 = vor.u32 1.1754944e-38, %v878_v30  ;;  %vm877_vm12 = vcmp.eq.f32.partialorder %v876_v22, 8.507059e+37  ;;  %v1969_v22 = vld [vmem:[%s3053_s2 + $0x20] sm:$0xff] }
 0x5fb   :  { %v855_v8 = vmul.f32 %v2144_v60, %v854_v2  ;;  %2149 = vpow2.f32 %v906_v18  ;;  %v2096_v18 = vld [vmem:[#allocation10] ss:$0 sm:$0xff] }
 0x5fd   :  { %v856_v10 = vadd.f32 %v2144_v60, %v855_v8 }
 0x5fe   :  { %v2146_v12 = vpop.eup %2145 }
 0x5ff   :  { %v860_v13 = vsel %vm859_vm6, %v2144_v60, %v856_v10  ;;  %v868_v17 = vmul.f32 %v2146_v12, %v851_v63  ;;  %vm873_vm8 = vweird.f32 %v2146_v12  ;;  %v2148_v44 = vpop.eup %2147 }
 0x600   :  { %v865_v14 = vsel %vm862_vm7, %v864_v11, %v860_v13  ;;  %vm874_vm11 = vmor %vm872_vm10, %vm873_vm8 }
 0x601   :  { %v882_v15 = vmul.f32 1.0614054, %v865_v14  ;;  %v869_v19 = vsub.f32 1.0, %v868_v17  ;;  %v2150_v60 = vpop.eup %2149 }
 0x603   :  { %v884_v20 = vadd.f32 -1.4531521, %v882_v15  ;;  %v870_v21 = vmul.f32 %v2146_v12, %v869_v19 }
 0x605   :  { %v886_v23 = vmul.f32 %v884_v20, %v865_v14  ;;  %v871_v25 = vadd.f32 %v2146_v12, %v870_v21  ;;  %v1970_v21 = vld [vmem:[%s3053_s2 + $0x28] sm:$0xff] }
 0x607   :  { %v888_v26 = vadd.f32 1.4214138, %v886_v23  ;;  %v875_v29 = vsel %vm874_vm11, %v2146_v12, %v871_v25 }
 0x608   :  { %v880_v32 = vsel %vm877_vm12, %v879_v27, %v875_v29 }
 0x609   :  { %v890_v31 = vmul.f32 %v888_v26, %v865_v14  ;;  %v883_v33 = vmul.f32 1.0614054, %v880_v32 }
 0x60b   :  { %v892_v35 = vadd.f32 -0.28449672, %v890_v31  ;;  %v885_v36 = vadd.f32 -1.4531521, %v883_v33 }
 0x60d   :  { %v894_v37 = vmul.f32 %v892_v35, %v865_v14  ;;  %v887_v39 = vmul.f32 %v885_v36, %v880_v32 }
 0x60f   :  { %v896_v40 = vadd.f32 0.2548296, %v894_v37  ;;  %v889_v42 = vadd.f32 1.4214138, %v887_v39 }
 0x611   :  { %v898_v43 = vmul.f32 %v896_v40, %v865_v14  ;;  %v891_v46 = vmul.f32 %v889_v42, %v880_v32 }
 0x613   :  { %v908_v47 = vmul.f32 %v2148_v44, %v898_v43  ;;  %v893_v50 = vadd.f32 -0.28449672, %v891_v46 }
 0x615   :  { %v910_v51 = vsub.f32 1.0, %v908_v47  ;;  %v895_v52 = vmul.f32 %v893_v50, %v880_v32 }
 0x617   :  { %v914_v53 = vsub.f32 0.0, %v910_v51  ;;  %v897_v54 = vadd.f32 0.2548296, %v895_v52 }
 0x619   :  { %v916_v56 = vsel %vm912_vm13, %v910_v51, %v914_v53  ;;  %v899_v59 = vmul.f32 %v897_v54, %v880_v32 }
 0x61a   :  { %v918_v57 = vadd.f32 1.0, %v916_v56 }
 0x61b   :  { %v909_v62 = vmul.f32 %v2150_v60, %v899_v59 }
 0x61c   :  { %v920_v61 = vmul.f32 %v918_v57, %v842_v58  ;;  %v2097_v58 = vld [vmem:[%s3054_s3 + $0x1] ss:$0 sm:$0xff]  ;;  %s3073_s3 = smov 16  }
 0x61d   :  { %v911_v63 = vsub.f32 1.0, %v909_v62 }
 0x61e   :  { %1967 = vmatmul.msk.f32.vlgmr.msra.gmra.mxu3 %vm934_vm14, %v920_v61 }
 0x61f   :  { %v915_v0 = vsub.f32 0.0, %v911_v63 }
 0x621   :  { %v917_v2 = vsel %vm913_vm15, %v911_v63, %v915_v0 }
 0x622   :  { %v919_v49 = vadd.f32 1.0, %v917_v2 }
 0x624   :  { %v921_v7 = vmul.f32 %v919_v49, %v843_v4 }
 0x626   :  { %1968 = vmatmul.msk.f32.gmra.mxu3 %vm934_vm14, %v921_v7 }
 0x6a1   :  { %v958_v8 = vpop.f32.mrf.mxu3 }
 0x6a2   :  { %v959_v9 = vadd.f32 %v2094_v48, %v958_v8 }
 0x6a4   :  { %v964_v5 = vadd.f32 %v959_v9, %v2700_v41 }
 0x6a6   :  { %v968_v1 = vsel %vm138_vm0, %v964_v5, 0.0 }
 0x6a7   :  { %969 = vadd.xlane.f32.xlu2 %v968_v1 }
 0x6a9   :  { %v961_v10 = vpop.f32.mrf.mxu3 }
 0x6aa   :  { %v962_v55 = vadd.f32 %v2094_v48, %v961_v10 }
 0x6ac   :  { %v965_v11 = vadd.f32 %v962_v55, %v2704_v45  ;;  %v1972_v45 = vld [vmem:[%s3053_s2 + $0x38] sm:$0xff] }
 0x6ad   :  { %1050 = vmatpush.msrb.mxu2 %v1972_v45 }
 0x6ae   :  { %v971_v24 = vsel %vm138_vm0, %v965_v11, 0.0 }
 0x6af   :  { %972 = vadd.xlane.f32.xlu1 %v971_v24  ;;  %1051 = vmatpush.msrb.mxu2 %v1971_v6 }
 0x6b1   :  { %1052 = vmatpush.msrb.mxu2 %v1970_v21 }
 0x6b3   :  { %1053 = vmatpush.msrb.mxu2 %v1969_v22 }
 0x71a   :  { %v970_v12 = vpop.xlane.xlu2 %969 }
 0x71b   :  { %v974_v13 = vmul.f32 %v970_v12, %v2677_v3  ;;  %v2203_v12 = vld [vmem:[#allocation2] sm:$0xff] }
 0x71d   :  { %v976_v14 = vsub.f32 %v964_v5, %v974_v13 }
 0x71f   :  { %v978_v16 = vmul.f32 %v976_v14, %v976_v14 }
 0x721   :  { %v980_v17 = vsel %vm138_vm0, %v978_v16, 0.0 }
 0x722   :  { %981 = vadd.xlane.f32.xlu2 %v980_v17  ;;  %v973_v15 = vpop.xlane.xlu1 %972 }
 0x723   :  { %v975_v41 = vmul.f32 %v973_v15, %v2677_v3 }
 0x725   :  { %v977_v19 = vsub.f32 %v965_v11, %v975_v41 }
 0x727   :  { %v979_v20 = vmul.f32 %v977_v19, %v977_v19 }
 0x729   :  { %v983_v30 = vsel %vm138_vm0, %v979_v20, 0.0 }
 0x72a   :  { %984 = vadd.xlane.f32.xlu1 %v983_v30  ;;  %v2204_v30 = vld [vmem:[#allocation2 + $0x8] sm:$0xff] }
 0x795   :  { %v982_v23 = vpop.xlane.xlu2 %981 }
 0x796   :  { %v986_v25 = vmul.f32 %v982_v23, %v2677_v3 }
 0x798   :  { %v988_v26 = vadd.f32 1e-05, %v986_v25 }
 0x79a   :  { %2151 = vrsqrt.f32 %v988_v26  ;;  %vm996_vm4 = vweird.f32 %v988_v26 }
 0x79d   :  { %v985_v27 = vpop.xlane.xlu1 %984 }
 0x79e   :  { %v987_v28 = vmul.f32 %v985_v27, %v2677_v3 }
 0x7a0   :  { %v2152_v29 = vpop.eup %2151  ;;  %v989_v34 = vadd.f32 1e-05, %v987_v28 }
 0x7a1   :  { %v991_v31 = vmul.f32 %v2152_v29, %v988_v26  ;;  %vm997_vm3 = vweird.f32 %v2152_v29 }
 0x7a2   :  { %2153 = vrsqrt.f32 %v989_v34  ;;  %vm998_vm5 = vmor %vm996_vm4, %vm997_vm3  ;;  %vm1006_vm7 = vweird.f32 %v989_v34 }
 0x7a3   :  { %v992_v32 = vmul.f32 %v2152_v29, %v991_v31 }
 0x7a5   :  { %v993_v33 = vmul.f32 0.5, %v992_v32 }
 0x7a7   :  { %v994_v35 = vsub.f32 1.5, %v993_v33 }
 0x7a8   :  { %v2154_v36 = vpop.eup %2153 }
 0x7a9   :  { %v995_v37 = vmul.f32 %v2152_v29, %v994_v35  ;;  %v1001_v39 = vmul.f32 %v2154_v36, %v989_v34  ;;  %vm1007_vm6 = vweird.f32 %v2154_v36 }
 0x7aa   :  { %vm1008_vm8 = vmor %vm1006_vm7, %vm1007_vm6 }
 0x7ab   :  { %v999_v40 = vsel %vm998_vm5, %v2152_v29, %v995_v37  ;;  %v1002_v43 = vmul.f32 %v2154_v36, %v1001_v39 }
 0x7ac   :  { %v1010_v42 = vmul.f32 %v999_v40, %v976_v14 }
 0x7ad   :  { %v1003_v46 = vmul.f32 0.5, %v1002_v43 }
 0x7ae   :  { %v1015_v44 = vmul.f32 %v2095_v38, %v1010_v42 }
 0x7af   :  { %v1004_v47 = vsub.f32 1.5, %v1003_v46 }
 0x7b0   :  { %v2781_v50 = vadd.f32 %v2096_v18, %v1015_v44 }
 0x7b1   :  { %v1005_v51 = vmul.f32 %v2154_v36, %v1004_v47 }
 0x7b2   :  { %1974 = vmatmul.msk.f32.vlgmr.msrb.gmra.mxu2 %vm138_vm0, %v2781_v50 }
 0x7b3   :  { %v1009_v52 = vsel %vm1008_vm8, %v2154_v36, %v1005_v51 }
 0x7b4   :  { %v1011_v53 = vmul.f32 %v1009_v52, %v977_v19 }
 0x7b6   :  { %v1016_v54 = vmul.f32 %v2095_v38, %v1011_v53 }
 0x7b8   :  { %v2785_v56 = vadd.f32 %v2096_v18, %v1016_v54 }
 0x7ba   :  { %1975 = vmatmul.msk.f32.gmra.mxu2 %vm138_vm0, %v2785_v56 }
 0x835   :  { %v1055_v57 = vpop.f32.mrf.mxu2 }
 0x836   :  { %v2792_v59 = vadd.f32 %v2097_v58, %v1055_v57 }
 0x838   :  { %1185 = vrot.lane.b32.xlu1 %v2792_v59, %s2366_s11  ;;  %1189 = vrot.lane.b32.xlu2 %v2792_v59, %s2367_s0 }
 0x83d   :  { %v1058_v60 = vpop.f32.mrf.mxu2 }
 0x83e   :  { %v2798_v61 = vadd.f32 %v2097_v58, %v1058_v60 }
 0x840   :  { %1191 = vrot.lane.b32.xlu0 %v2798_v61, %s2367_s0  ;;  %1443 = vrot.lane.b32.xlu1 %v2798_v61, %s2370_s21  ;;  %v2852_v18 = vpack.i.bf16 %v2792_v59, %v2798_v61 }
 0x841   :  { %1187 = vrot.lane.b32.xlu2 %v2798_v61, %s2366_s11 }
 0x848   :  { %1065 = vrot.lane.b32.xlu0 %v2798_v61, %s2368_s17  ;;  %1317 = vrot.lane.b32.xlu1 %v2798_v61, %s2371_s23 }
 0x849   :  { %1437 = vrot.lane.b32.xlu2 %v2792_v59, %s2369_s20 }
 0x850   :  { %1063 = vrot.lane.b32.xlu0 %v2792_v59, %s2368_s17  ;;  %1311 = vrot.lane.b32.xlu1 %v2792_v59, %s2372_s5 }
 0x851   :  { %1439 = vrot.lane.b32.xlu2 %v2798_v61, %s2369_s20 }
 0x858   :  { %1441 = vrot.lane.b32.xlu0 %v2792_v59, %s2370_s21 }
 0x860   :  { %1315 = vrot.lane.b32.xlu0 %v2792_v59, %s2371_s23 }
 0x868   :  { %1313 = vrot.lane.b32.xlu0 %v2798_v61, %s2372_s5 }
 0x892   :  { %v1190_v0 = vpop.permute.xlu2 %1189 }
 0x89b   :  { %v1188_v49 = vpop.permute.xlu2 %1187 }
 0x8a3   :  { %v1438_v9 = vpop.permute.xlu2 %1437 }
 0x8aa   :  { %v1186_v62 = vpop.permute.xlu1 %1185 }
 0x8ab   :  { %v1440_v1 = vpop.permute.xlu2 %1439 }
 0x8b2   :  { %v1192_v63 = vpop.permute.xlu0 %1191  ;;  %v1444_v2 = vpop.permute.xlu1 %1443 }
 0x8b3   :  { %1982 = vmatpush.xpose.msk.msrb.mxu3 %vm174_vm1, %v1192_v63 }
 0x8b7   :  { %1983 = vmatpush.xpose.msk.msrb.mxu3 %vm174_vm1, %v1190_v0 }
 0x8ba   :  { %v1066_v4 = vpop.permute.xlu0 %1065  ;;  %1984 = vmatmul.msk.f32.vlgmr.msrb.gmra.mxu3 %vm174_vm1, %v1186_v62  ;;  %v1318_v48 = vpop.permute.xlu1 %1317 }
 0x8bb   :  { %1994 = vmatpush.xpose.msk.msra.mxu3 %vm174_vm1, %v1444_v2  ;;  %1976 = vmatpush.xpose.msk.msrb.mxu0 %vm174_vm1, %v1066_v4 }
 0x8c2   :  { %v1064_v7 = vpop.permute.xlu0 %1063  ;;  %1985 = vmatmul.msk.f32.gmra.mxu3 %vm174_vm1, %v1188_v49  ;;  %v1312_v10 = vpop.permute.xlu1 %1311 }
 0x8c3   :  { %1977 = vmatpush.xpose.msk.msrb.mxu0 %vm174_vm1, %v1064_v7 }
 0x8c6   :  { %1978 = vmatmul.msk.f32.vlgmr.msrb.gmra.mxu0 %vm174_vm1, %v2792_v59 }
 0x8c7   :  { %1988 = vmatpush.xpose.msk.msra.mxu0 %vm174_vm1, %v1318_v48 }
 0x8ca   :  { %v1442_v8 = vpop.permute.xlu0 %1441 }
 0x8cb   :  { %1995 = vmatpush.xpose.msk.msra.mxu3 %vm174_vm1, %v1442_v8 }
 0x8ce   :  { %1979 = vmatmul.msk.f32.gmra.mxu0 %vm174_vm1, %v2798_v61  ;;  %1996 = vmatmul.msk.f32.vlgmr.msra.gmra.mxu3 %vm174_vm1, %v1438_v9 }
 0x8d2   :  { %v1316_v5 = vpop.permute.xlu0 %1315 }
 0x8d3   :  { %1989 = vmatpush.xpose.msk.msra.mxu0 %vm174_vm1, %v1316_v5 }
 0x8d6   :  { %1990 = vmatmul.msk.f32.vlgmr.msra.gmra.mxu0 %vm174_vm1, %v1312_v10  ;;  %1997 = vmatmul.msk.f32.gmra.mxu3 %vm174_vm1, %v1440_v1 }
 0x8da   :  { %v1314_v55 = vpop.permute.xlu0 %1313 }
 0x8de   :  { %1991 = vmatmul.msk.f32.gmra.mxu0 %vm174_vm1, %v1314_v55 }
 0x93d   :  { %v1218_v11 = vpop.f32.mrf.mxu3 }
 0x93e   :  { %v1224_v24 = vmul.f32 0.35355338, %v1218_v11 }
 0x940   :  { %v1226_v13 = vadd.f32 %v2203_v12, %v1224_v24 }
 0x942   :  { %v1228_v14 = vsel %vm210_vm2, %v1226_v13, -inf }
 0x943   :  { %v1092_v16 = vpop.f32.mrf.mxu0  ;;  %1229 = vmax.xlane.f32.xlu2 %v1228_v14 }
 0x944   :  { %v1098_v17 = vmul.f32 0.35355338, %v1092_v16 }
 0x945   :  { %v1221_v15 = vpop.f32.mrf.mxu3 }
 0x946   :  { %v1225_v41 = vmul.f32 0.35355338, %v1221_v15  ;;  %v1100_v19 = vadd.f32 %v2203_v12, %v1098_v17 }
 0x948   :  { %v1102_v20 = vsel %vm210_vm2, %v1100_v19, -inf  ;;  %v1227_v45 = vadd.f32 %v2204_v30, %v1225_v41 }
 0x949   :  { %1103 = vmax.xlane.f32.xlu1 %v1102_v20 }
 0x94a   :  { %v1231_v6 = vsel %vm210_vm2, %v1227_v45, -inf }
 0x94b   :  { %v1095_v21 = vpop.f32.mrf.mxu0  ;;  %1232 = vmax.xlane.f32.xlu0 %v1231_v6 }
 0x94c   :  { %v1099_v22 = vmul.f32 0.35355338, %v1095_v21 }
 0x94e   :  { %v1101_v23 = vadd.f32 %v2204_v30, %v1099_v22 }
 0x950   :  { %v1105_v25 = vsel %vm210_vm2, %v1101_v23, -inf }
 0x951   :  { %1106 = vmax.xlane.f32.xlu2 %v1105_v25  ;;  %v1470_v26 = vpop.f32.mrf.mxu3 }
 0x952   :  { %v1476_v27 = vmul.f32 0.35355338, %v1470_v26 }
 0x953   :  { %v1344_v28 = vpop.f32.mrf.mxu0 }
 0x954   :  { %v1350_v29 = vmul.f32 0.35355338, %v1344_v28  ;;  %v1478_v31 = vadd.f32 %v2203_v12, %v1476_v27 }
 0x956   :  { %v1480_v34 = vsel %vm210_vm2, %v1478_v31, -inf  ;;  %v1352_v32 = vadd.f32 %v2203_v12, %v1350_v29 }
 0x957   :  { %1481 = vmax.xlane.f32.xlu1 %v1480_v34 }
 0x958   :  { %v1354_v33 = vsel %vm210_vm2, %v1352_v32, -inf }
 0x959   :  { %1355 = vmax.xlane.f32.xlu2 %v1354_v33  ;;  %v1473_v35 = vpop.f32.mrf.mxu3 }
 0x95a   :  { %v1477_v36 = vmul.f32 0.35355338, %v1473_v35 }
 0x95b   :  { %v1347_v37 = vpop.f32.mrf.mxu0 }
 0x95c   :  { %v1351_v38 = vmul.f32 0.35355338, %v1347_v37  ;;  %v1479_v39 = vadd.f32 %v2204_v30, %v1477_v36 }
 0x95e   :  { %v1483_v40 = vsel %vm210_vm2, %v1479_v39, -inf  ;;  %v1353_v42 = vadd.f32 %v2204_v30, %v1351_v38 }
 0x95f   :  { %1484 = vmax.xlane.f32.xlu0 %v1483_v40 }
 0x960   :  { %v1357_v43 = vsel %vm210_vm2, %v1353_v42, -inf }
 0x961   :  { %1358 = vmax.xlane.f32.xlu1 %v1357_v43 }
 0x973   :  { %2075 = vrot.lane.b32.xlu0 %v2852_v18, %s2374_s24 }
 0x97a   :  { %2070 = vrot.lane.b32.xlu1 %v2852_v18, %s2373_s22 }
 0x9b6   :  { %v1230_v44 = vpop.xlane.xlu2 %1229 }
 0x9b7   :  { %v1234_v46 = vsub.f32 %v1226_v13, %v1230_v44 }
 0x9b9   :  { %v1236_v47 = vmul.f32 1.442695, %v1234_v46 }
 0x9bb   :  { %2155 = vpow2.f32 %v1236_v47 }
 0x9bc   :  { %v1104_v51 = vpop.xlane.xlu1 %1103 }
 0x9bd   :  { %v1108_v52 = vsub.f32 %v1100_v19, %v1104_v51 }
 0x9be   :  { %v1233_v53 = vpop.xlane.xlu0 %1232 }
 0x9bf   :  { %v1110_v54 = vmul.f32 1.442695, %v1108_v52  ;;  %v1235_v58 = vsub.f32 %v1227_v45, %v1233_v53 }
 0x9c1   :  { %v2858_v57 = vpop.eup %2155  ;;  %2157 = vpow2.f32 %v1110_v54  ;;  %v1238_v59 = vmul.f32 1.442695, %v1235_v58 }
 0x9c2   :  { %v1240_v60 = vsel %vm210_vm2, %v2858_v57, 0.0 }
 0x9c3   :  { %2159 = vpow2.f32 %v1238_v59  ;;  %1241 = vadd.xlane.f32.xlu2 %v1240_v60 }
 0x9c4   :  { %v1107_v61 = vpop.xlane.xlu2 %1106 }
 0x9c5   :  { %v1109_v62 = vsub.f32 %v1101_v23, %v1107_v61 }
 0x9c7   :  { %v2862_v63 = vpop.eup %2157  ;;  %v1112_v0 = vmul.f32 1.442695, %v1109_v62 }
 0x9c8   :  { %v1114_v2 = vsel %vm210_vm2, %v2862_v63, 0.0 }
 0x9c9   :  { %v2866_v4 = vpop.eup %2159  ;;  %2161 = vpow2.f32 %v1112_v0  ;;  %1115 = vadd.xlane.f32.xlu0 %v1114_v2 }
 0x9ca   :  { %v1482_v49 = vpop.xlane.xlu1 %1481  ;;  %v1243_v7 = vsel %vm210_vm2, %v2866_v4, 0.0 }
 0x9cb   :  { %v1486_v48 = vsub.f32 %v1478_v31, %v1482_v49  ;;  %1244 = vadd.xlane.f32.xlu1 %v1243_v7 }
 0x9cc   :  { %v1356_v8 = vpop.xlane.xlu2 %1355 }
 0x9cd   :  { %v1488_v9 = vmul.f32 1.442695, %v1486_v48  ;;  %v1360_v5 = vsub.f32 %v1352_v32, %v1356_v8 }
 0x9cf   :  { %v2870_v1 = vpop.eup %2161  ;;  %2163 = vpow2.f32 %v1488_v9  ;;  %v1362_v10 = vmul.f32 1.442695, %v1360_v5 }
 0x9d0   :  { %v1117_v55 = vsel %vm210_vm2, %v2870_v1, 0.0 }
 0x9d1   :  { %2165 = vpow2.f32 %v1362_v10  ;;  %1118 = vadd.xlane.f32.xlu2 %v1117_v55 }
 0x9d2   :  { %v1485_v11 = vpop.xlane.xlu0 %1484 }
 0x9d3   :  { %v1487_v24 = vsub.f32 %v1479_v39, %v1485_v11 }
 0x9d4   :  { %v1359_v12 = vpop.xlane.xlu1 %1358 }
 0x9d5   :  { %v2874_v13 = vpop.eup %2163  ;;  %v1490_v14 = vmul.f32 1.442695, %v1487_v24  ;;  %v1361_v15 = vsub.f32 %v1353_v42, %v1359_v12 }
 0x9d6   :  { %v1492_v16 = vsel %vm210_vm2, %v2874_v13, 0.0 }
 0x9d7   :  { %v2878_v17 = vpop.eup %2165  ;;  %2167 = vpow2.f32 %v1490_v14  ;;  %1493 = vadd.xlane.f32.xlu0 %v1492_v16  ;;  %v1364_v19 = vmul.f32 1.442695, %v1361_v15 }
 0x9d8   :  { %v1366_v41 = vsel %vm210_vm2, %v2878_v17, 0.0 }
 0x9d9   :  { %1367 = vadd.xlane.f32.xlu2 %v1366_v41  ;;  %2169 = vpow2.f32 %v1364_v19 }
 0x9dd   :  { %v2882_v20 = vpop.eup %2167 }
 0x9de   :  { %v1495_v30 = vsel %vm210_vm2, %v2882_v20, 0.0 }
 0x9df   :  { %v2888_v45 = vpop.eup %2169 }
 0x9e0   :  { %v1369_v23 = vsel %vm210_vm2, %v2888_v45, 0.0 }
 0x9e1   :  { %1496 = vadd.xlane.f32.xlu2 %v1495_v30 }
 0x9e4   :  { %2085 = vrot.lane.b32.xlu1 %v2852_v18, %s2375_s25 }
 0x9e5   :  { %v2076_v6 = vpop.permute.xlu0 %2075 }
 0x9e6   :  { %v2077_v21 = vunpack.i.l.bf16 %v2076_v6  ;;  %v2078_v22 = vunpack.i.h.bf16 %v2076_v6 }
 0x9e8   :  { %1176 = vmatpush.msrb.mxu1 %v2077_v21 }
 0x9e9   :  { %1370 = vadd.xlane.f32.xlu2 %v1369_v23 }
 0x9ea   :  { %1177 = vmatpush.msrb.mxu1 %v2078_v22 }
 0x9eb   :  { %2080 = vrot.lane.b32.xlu0 %v2852_v18, %s2376_s13 }
 0x9ec   :  { %v2071_v25 = vpop.permute.xlu1 %2070 }
 0x9ed   :  { %v2072_v26 = vunpack.i.l.bf16 %v2071_v25  ;;  %v2073_v27 = vunpack.i.h.bf16 %v2071_v25 }
 0x9ef   :  { %1302 = vmatpush.msra.mxu2 %v2072_v26 }
 0x9f1   :  { %1303 = vmatpush.msra.mxu2 %v2073_v27 }
 0xa36   :  { %v1242_v28 = vpop.xlane.xlu2 %1241 }
 0xa37   :  { %2171 = vrcp.f32 %v1242_v28  ;;  %v1257_v35 = vand.u32 2147483648, %v1242_v28  ;;  %v1255_v37 = vand.u32 2147483647, %v1242_v28  ;;  %vm1251_vm11 = vweird.f32 %v1242_v28 }
 0xa39   :  { %v1258_v18 = vor.u32 1.1754944e-38, %v1257_v35  ;;  %vm1256_vm13 = vcmp.eq.f32.partialorder %v1255_v37, 8.507059e+37 }
 0xa3c   :  { %v1116_v29 = vpop.xlane.xlu0 %1115 }
 0xa3d   :  { %v2172_v31 = vpop.eup %2171  ;;  %2173 = vrcp.f32 %v1116_v29  ;;  %v1129_v52 = vand.u32 2147483647, %v1116_v29  ;;  %v1131_v53 = vand.u32 2147483648, %v1116_v29  ;;  %vm1125_vm3 = vweird.f32 %v1116_v29 }
 0xa3e   :  { %v1247_v34 = vmul.f32 %v2172_v31, %v1242_v28  ;;  %v1245_v32 = vpop.xlane.xlu1 %1244  ;;  %vm1252_vm10 = vweird.f32 %v2172_v31 }
 0xa3f   :  { %2175 = vrcp.f32 %v1245_v32  ;;  %vm1253_vm12 = vmor %vm1251_vm11, %vm1252_vm10  ;;  %v1272_v62 = vand.u32 2147483648, %v1245_v32  ;;  %v1132_v49 = vor.u32 1.1754944e-38, %v1131_v53  ;;  %v1270_v7 = vand.u32 2147483647, %v1245_v32 }
 0xa40   :  { %v1248_v33 = vsub.f32 1.0, %v1247_v34  ;;  %vm1130_vm6 = vcmp.eq.f32.partialorder %v1129_v52, 8.507059e+37  ;;  %vm1266_vm7 = vweird.f32 %v1245_v32 }
 0xa41   :  { %v1273_v10 = vor.u32 1.1754944e-38, %v1272_v62  ;;  %vm1271_vm10 = vcmp.eq.f32.partialorder %v1270_v7, 8.507059e+37 }
 0xa42   :  { %v1249_v36 = vmul.f32 %v2172_v31, %v1248_v33 }
 0xa43   :  { %v2174_v38 = vpop.eup %2173 }
 0xa44   :  { %v1250_v39 = vadd.f32 %v2172_v31, %v1249_v36  ;;  %v1121_v40 = vmul.f32 %v2174_v38, %v1116_v29  ;;  %v1119_v42 = vpop.xlane.xlu2 %1118  ;;  %vm1126_vm15 = vweird.f32 %v2174_v38 }
 0xa45   :  { %v2176_v43 = vpop.eup %2175  ;;  %2177 = vrcp.f32 %v1119_v42  ;;  %vm1127_vm4 = vmor %vm1125_vm3, %vm1126_vm15  ;;  %v1146_v11 = vand.u32 2147483648, %v1119_v42  ;;  %v1144_v15 = vand.u32 2147483647, %v1119_v42 }
 0xa46   :  { %v1254_v44 = vsel %vm1253_vm12, %v2172_v31, %v1250_v39  ;;  %v1122_v46 = vsub.f32 1.0, %v1121_v40  ;;  %v1262_v47 = vmul.f32 %v2176_v43, %v1245_v32  ;;  %vm1267_vm5 = vweird.f32 %v2176_v43  ;;  %v2098_v39 = vld [vmem:[#allocation7 + $0x1] ss:$0 sm:$0xff] }
 0xa47   :  { %v1259_v51 = vsel %vm1256_vm13, %v1258_v18, %v1254_v44  ;;  %vm1268_vm8 = vmor %vm1266_vm7, %vm1267_vm5  ;;  %vm1140_vm12 = vweird.f32 %v1119_v42  ;;  %v1147_v22 = vor.u32 1.1754944e-38, %v1146_v11  ;;  %vm1145_vm15 = vcmp.eq.f32.partialorder %v1144_v15, 8.507059e+37 }
 0xa48   :  { %v1123_v54 = vmul.f32 %v2174_v38, %v1122_v46  ;;  %v1263_v58 = vsub.f32 1.0, %v1262_v47  ;;  %v1260_v59 = vmul.f32 %v2858_v57, %v1259_v51 }
 0xa4a   :  { %v1124_v60 = vadd.f32 %v2174_v38, %v1123_v54  ;;  %v1264_v61 = vmul.f32 %v2176_v43, %v1263_v58  ;;  %v2895_v0 = vpop.xlane.xlu0 %1493  ;;  %1986 = vmatmul.msk.f32.vlgmr.msra.gmra.mxu2 %vm210_vm2, %v1260_v59 }
 0xa4b   :  { %v2178_v2 = vpop.eup %2177  ;;  %2179 = vrcp.f32 %v2895_v0  ;;  %v1509_v34 = vand.u32 2147483648, %v2895_v0  ;;  %vm1503_vm5 = vweird.f32 %v2895_v0 }
 0xa4c   :  { %v1128_v48 = vsel %vm1127_vm4, %v2174_v38, %v1124_v60  ;;  %v1136_v8 = vmul.f32 %v2178_v2, %v1119_v42  ;;  %v1368_v9 = vpop.xlane.xlu2 %1367  ;;  %v1265_v57 = vadd.f32 %v2176_v43, %v1264_v61  ;;  %vm1141_vm11 = vweird.f32 %v2178_v2 }
 0xa4d   :  { %v1133_v5 = vsel %vm1130_vm6, %v1132_v49, %v1128_v48  ;;  %2181 = vrcp.f32 %v1368_v9  ;;  %vm1142_vm13 = vmor %vm1140_vm12, %vm1141_vm11  ;;  %v1383_v32 = vand.u32 2147483648, %v1368_v9  ;;  %v1381_v37 = vand.u32 2147483647, %v1368_v9 }
 0xa4e   :  { %v1137_v55 = vsub.f32 1.0, %v1136_v8  ;;  %v1134_v24 = vmul.f32 %v2862_v63, %v1133_v5  ;;  %v1269_v12 = vsel %vm1268_vm8, %v2176_v43, %v1265_v57  ;;  %v1507_v38 = vand.u32 2147483647, %v2895_v0 }
 0xa4f   :  { %v1274_v16 = vsel %vm1271_vm10, %v1273_v10, %v1269_v12  ;;  %vm1377_vm7 = vweird.f32 %v1368_v9  ;;  %v1384_v18 = vor.u32 1.1754944e-38, %v1383_v32  ;;  %v1510_v44 = vor.u32 1.1754944e-38, %v1509_v34 }
 0xa50   :  { %v1138_v14 = vmul.f32 %v2178_v2, %v1137_v55  ;;  %1980 = vmatmul.msk.f32.vlgmr.msrb.gmra.mxu1 %vm210_vm2, %v1134_v24  ;;  %v1275_v19 = vmul.f32 %v2866_v4, %v1274_v16  ;;  %vm1382_vm10 = vcmp.eq.f32.partialorder %v1381_v37, 8.507059e+37  ;;  %vm1508_vm11 = vcmp.eq.f32.partialorder %v1507_v38, 8.507059e+37 }
 0xa51   :  { %v2180_v41 = vpop.eup %2179 }
 0xa52   :  { %v1499_v30 = vmul.f32 %v2180_v41, %v2895_v0  ;;  %v1139_v6 = vadd.f32 %v2178_v2, %v1138_v14  ;;  %1987 = vmatmul.msk.f32.gmra.mxu2 %vm210_vm2, %v1275_v19  ;;  %vm1504_vm3 = vweird.f32 %v2180_v41 }
 0xa53   :  { %v2182_v21 = vpop.eup %2181  ;;  %vm2909_vm6 = vmor %vm1503_vm5, %vm1504_vm3 }
 0xa54   :  { %v1500_v63 = vsub.f32 1.0, %v1499_v30  ;;  %v1373_v23 = vmul.f32 %v2182_v21, %v1368_v9  ;;  %v1497_v25 = vpop.xlane.xlu2 %1496  ;;  %v1143_v26 = vsel %vm1142_vm13, %v2178_v2, %v1139_v6  ;;  %vm1378_vm4 = vweird.f32 %v2182_v21 }
 0xa55   :  { %2183 = vrcp.f32 %v1497_v25  ;;  %v1148_v27 = vsel %vm1145_vm15, %v1147_v22, %v1143_v26  ;;  %vm1379_vm8 = vmor %vm1377_vm7, %vm1378_vm4  ;;  %v1524_v62 = vand.u32 2147483648, %v1497_v25  ;;  %v1522_v49 = vand.u32 2147483647, %v1497_v25  ;;  %v2000_v26 = vld [vmem:[%s3055_s4 + $0x20] sm:$0xff] }
 0xa56   :  { %v1501_v28 = vmul.f32 %v2180_v41, %v1500_v63  ;;  %v1374_v29 = vsub.f32 1.0, %v1373_v23  ;;  %v2086_v31 = vpop.permute.xlu1 %2085  ;;  %v1149_v4 = vmul.f32 %v2870_v1, %v1148_v27  ;;  %vm1518_vm13 = vweird.f32 %v1497_v25  ;;  %v2002_v23 = vld [vmem:[%s3055_s4 + $0x30] sm:$0xff] }
 0xa57   :  { %v2087_v33 = vunpack.i.l.bf16 %v2086_v31  ;;  %v2088_v40 = vunpack.i.h.bf16 %v2086_v31  ;;  %v1525_v8 = vor.u32 1.1754944e-38, %v1524_v62  ;;  %vm1523_vm3 = vcmp.eq.f32.partialorder %v1522_v49, 8.507059e+37  ;;  %v2007_v49 = vld [vmem:[%s3057_s6 + $0x20] sm:$0xff] }
 0xa58   :  { %v1502_v35 = vadd.f32 %v2180_v41, %v1501_v28  ;;  %v1375_v36 = vmul.f32 %v2182_v21, %v1374_v29  ;;  %1981 = vmatmul.msk.f32.gmra.mxu1 %vm210_vm2, %v1149_v4 }
 0xa59   :  { %1428 = vmatpush.msra.mxu1 %v2087_v33 }
 0xa5a   :  { %v1376_v1 = vadd.f32 %v2182_v21, %v1375_v36  ;;  %v1506_v43 = vsel %vm2909_vm6, %v2180_v41, %v1502_v35 }
 0xa5b   :  { %v2184_v42 = vpop.eup %2183  ;;  %1429 = vmatpush.msra.mxu1 %v2088_v40  ;;  %v1511_v54 = vsel %vm1508_vm11, %v1510_v44, %v1506_v43 }
 0xa5c   :  { %v1380_v46 = vsel %vm1379_vm8, %v2182_v21, %v1376_v1  ;;  %v1514_v47 = vmul.f32 %v2184_v42, %v1497_v25  ;;  %v1371_v51 = vpop.xlane.xlu2 %1370  ;;  %vm1519_vm12 = vweird.f32 %v2184_v42  ;;  %v1512_v2 = vmul.f32 %v2874_v13, %v1511_v54  ;;  %v2001_v25 = vld [vmem:[%s3055_s4 + $0x28] sm:$0xff] }
 0xa5d   :  { %v1385_v52 = vsel %vm1382_vm10, %v1384_v18, %v1380_v46  ;;  %2185 = vrcp.f32 %v1371_v51  ;;  %v2081_v53 = vpop.permute.xlu0 %2080  ;;  %vm1520_vm15 = vmor %vm1518_vm13, %vm1519_vm12  ;;  %v1398_v10 = vand.u32 2147483648, %v1371_v51  ;;  %v1396_v11 = vand.u32 2147483647, %v1371_v51 }
 0xa5e   :  { %v1515_v58 = vsub.f32 1.0, %v1514_v47  ;;  %v2082_v59 = vunpack.i.l.bf16 %v2081_v53  ;;  %v1386_v60 = vmul.f32 %v2878_v17, %v1385_v52  ;;  %v2083_v0 = vunpack.i.h.bf16 %v2081_v53 }
 0xa5f   :  { %vm1392_vm5 = vweird.f32 %v1371_v51  ;;  %v1399_v12 = vor.u32 1.1754944e-38, %v1398_v10  ;;  %vm1397_vm7 = vcmp.eq.f32.partialorder %v1396_v11, 8.507059e+37 }
 0xa60   :  { %v1516_v61 = vmul.f32 %v2184_v42, %v1515_v58  ;;  %1554 = vmatpush.msrb.mxu2 %v2082_v59  ;;  %1992 = vmatmul.msk.f32.vlgmr.msra.gmra.mxu1 %vm210_vm2, %v1386_v60 }
 0xa62   :  { %1555 = vmatpush.msrb.mxu2 %v2083_v0  ;;  %v1517_v7 = vadd.f32 %v2184_v42, %v1516_v61  ;;  %v2009_v0 = vld [vmem:[%s3057_s6 + $0x30] sm:$0xff] }
 0xa63   :  { %v2186_v48 = vpop.eup %2185  ;;  %1998 = vmatmul.msk.f32.vlgmr.msrb.gmra.mxu2 %vm210_vm2, %v1512_v2  ;;  %v2008_v2 = vld [vmem:[%s3057_s6 + $0x28] sm:$0xff] }
 0xa64   :  { %v1388_v9 = vmul.f32 %v2186_v48, %v1371_v51  ;;  %v1521_v17 = vsel %vm1520_vm15, %v2184_v42, %v1517_v7  ;;  %vm1393_vm4 = vweird.f32 %v2186_v48 }
 0xa65   :  { %v1526_v5 = vsel %vm1523_vm3, %v1525_v8, %v1521_v17  ;;  %vm1394_vm6 = vmor %vm1392_vm5, %vm1393_vm4 }
 0xa66   :  { %v1389_v57 = vsub.f32 1.0, %v1388_v9  ;;  %v1527_v13 = vmul.f32 %v2882_v20, %v1526_v5 }
 0xa68   :  { %v1390_v55 = vmul.f32 %v2186_v48, %v1389_v57 }
 0xa6a   :  { %v1391_v24 = vadd.f32 %v2186_v48, %v1390_v55 }
 0xa6b   :  { %1999 = vmatmul.msk.f32.gmra.mxu2 %vm210_vm2, %v1527_v13 }
 0xa6c   :  { %v1395_v14 = vsel %vm1394_vm6, %v2186_v48, %v1391_v24 }
 0xa6d   :  { %v1400_v16 = vsel %vm1397_vm7, %v1399_v12, %v1395_v14  ;;  %v2099_v14 = vld [vmem:[%s3061_s10 + $0x1] ss:$0 sm:$0xff] }
 0xa6e   :  { %v1401_v15 = vmul.f32 %v2888_v45, %v1400_v16  ;;  %v2003_v45 = vld [vmem:[%s3055_s4 + $0x38] sm:$0xff] }
 0xa6f   :  { %1621 = vmatpush.msrb.mxu0 %v2003_v45 }
 0xa70   :  { %1993 = vmatmul.msk.f32.gmra.mxu1 %vm210_vm2, %v1401_v15 }
 0xa71   :  { %1622 = vmatpush.msrb.mxu0 %v2002_v23 }
 0xa73   :  { %1623 = vmatpush.msrb.mxu0 %v2001_v25 }
 0xa75   :  { %1624 = vmatpush.msrb.mxu0 %v2000_v26 }
 0xacd   :  { %v1305_v41 = vpop.f32.mrf.mxu2  ;;  %v1179_v19 = vpop.f32.mrf.mxu1 }
 0xace   :  { %1565 = vrot.lane.b32.xlu2 %v1305_v41, %s2359_s19 }
 0xad5   :  { %v1182_v30 = vpop.f32.mrf.mxu1  ;;  %v1308_v6 = vpop.f32.mrf.mxu2 }
 0xadd   :  { %v1431_v20 = vpop.f32.mrf.mxu1 }
 0xade   :  { %1573 = vrot.lane.b32.xlu0 %v1431_v20, %s3073_s3 }
 0xae6   :  { %v1557_v21 = vpop.f32.mrf.mxu2  ;;  %1567 = vrot.lane.b32.xlu0 %v1308_v6, %s2359_s19 }
 0xae7   :  { %1581 = vrot.lane.b32.xlu1 %v1557_v21, %s2377_s26 }
 0xaed   :  { %v1434_v22 = vpop.f32.mrf.mxu1 }
 0xaee   :  { %v1560_v63 = vpop.f32.mrf.mxu2 }
 0xaef   :  { %1583 = vrot.lane.b32.xlu0 %v1560_v63, %s2377_s26  ;;  %1575 = vrot.lane.b32.xlu1 %v1434_v22, %s3073_s3  ;;  %s2379_s26 = smov [#allocation11]  }
 0xb28   :  { %v1566_v28 = vpop.permute.xlu2 %1565 }
 0xb29   :  { %v1587_v29 = vsel %vm174_vm1, %v1179_v19, %v1566_v28 }
 0xb50   :  { %v1574_v27 = vpop.permute.xlu0 %1573 }
 0xb51   :  { %v1589_v31 = vsel %vm210_vm2, %v1587_v29, %v1574_v27  ;;  %v2101_v27 = vld [vmem:[%s3058_s7 + $0x1] ss:$0 sm:$0xff] }
 0xb58   :  { %v1568_v4 = vpop.permute.xlu0 %1567 }
 0xb59   :  { %v1582_v34 = vpop.permute.xlu1 %1581  ;;  %v1588_v33 = vsel %vm174_vm1, %v1182_v30, %v1568_v4  ;;  %v2100_v30 = vld [vmem:[#allocation8 + $0x1] ss:$0 sm:$0xff] }
 0xb5a   :  { %v1591_v32 = vsel %vm700_vm9, %v1589_v31, %v1582_v34 }
 0xb5b   :  { %2004 = vmatmul.msk.f32.vlgmr.msrb.gmra.mxu0 %vm138_vm0, %v1591_v32 }
 0xb61   :  { %v1584_v35 = vpop.permute.xlu0 %1583  ;;  %v1576_v36 = vpop.permute.xlu1 %1575 }
 0xb62   :  { %v1590_v37 = vsel %vm210_vm2, %v1588_v33, %v1576_v36  ;;  %v2021_v36 = vld [vmem:[%s3059_s8 + $0x78] sm:$0xff] }
 0xb63   :  { %v1592_v38 = vsel %vm700_vm9, %v1590_v37, %v1584_v35  ;;  %1839 = vmatpush.msrb.mxu3 %v2021_v36 }
 0xb64   :  { %2005 = vmatmul.msk.f32.gmra.mxu0 %vm138_vm0, %v1592_v38  ;;  %v2020_v38 = vld [vmem:[%s3059_s8 + $0x70] sm:$0xff] }
 0xb65   :  { %1840 = vmatpush.msrb.mxu3 %v2020_v38 }
 0xbd8   :  { %v1626_v1 = vpop.f32.mrf.mxu0 }
 0xbd9   :  { %v1627_v40 = vadd.f32 %v2098_v39, %v1626_v1  ;;  %v2019_v1 = vld [vmem:[%s3059_s8 + $0x68] sm:$0xff] }
 0xbda   :  { %1841 = vmatpush.msrb.mxu3 %v2019_v1 }
 0xbdb   :  { %v1632_v42 = vadd.f32 %v1627_v40, %v2781_v50 }
 0xbdd   :  { %v1638_v43 = vsel %vm138_vm0, %v1632_v42, 0.0 }
 0xbde   :  { %1639 = vadd.xlane.f32.xlu1 %v1638_v43  ;;  %v2018_v43 = vld [vmem:[%s3059_s8 + $0x60] sm:$0xff] }
 0xbdf   :  { %1842 = vmatpush.msrb.mxu3 %v2018_v43 }
 0xbe1   :  { %v1629_v18 = vpop.f32.mrf.mxu0 }
 0xbe2   :  { %v1630_v44 = vadd.f32 %v2098_v39, %v1629_v18 }
 0xbe4   :  { %v1633_v46 = vadd.f32 %v1630_v44, %v2785_v56  ;;  %v2010_v56 = vld [vmem:[%s3057_s6 + $0x38] sm:$0xff]  ;;  %s3074_s6 = smov 128  }
 0xbe5   :  { %1720 = vmatpush.msrb.mxu1 %v2010_v56 }
 0xbe6   :  { %v1641_v47 = vsel %vm138_vm0, %v1633_v46, 0.0 }
 0xbe7   :  { %1642 = vadd.xlane.f32.xlu2 %v1641_v47  ;;  %1721 = vmatpush.msrb.mxu1 %v2009_v0 }
 0xbe9   :  { %1722 = vmatpush.msrb.mxu1 %v2008_v2 }
 0xbeb   :  { %1723 = vmatpush.msrb.mxu1 %v2007_v49 }
 0xc51   :  { %v1640_v51 = vpop.xlane.xlu1 %1639 }
 0xc52   :  { %v1644_v52 = vmul.f32 %v1640_v51, %v2677_v3 }
 0xc54   :  { %v1646_v53 = vsub.f32 %v1632_v42, %v1644_v52  ;;  %v2016_v52 = vld [vmem:[%s3059_s8 + $0x50] sm:$0xff] }
 0xc56   :  { %v1648_v54 = vmul.f32 %v1646_v53, %v1646_v53 }
 0xc58   :  { %v1650_v58 = vsel %vm138_vm0, %v1648_v54, 0.0 }
 0xc59   :  { %1651 = vadd.xlane.f32.xlu0 %v1650_v58  ;;  %v2015_v58 = vld [vmem:[%s3059_s8 + $0x48] sm:$0xff] }
 0xc5a   :  { %v1643_v59 = vpop.xlane.xlu2 %1642 }
 0xc5b   :  { %v1645_v50 = vmul.f32 %v1643_v59, %v2677_v3  ;;  %v2014_v59 = vld [vmem:[%s3059_s8 + $0x40] sm:$0xff] }
 0xc5d   :  { %v1647_v60 = vsub.f32 %v1633_v46, %v1645_v50  ;;  %v2017_v46 = vld [vmem:[%s3059_s8 + $0x58] sm:$0xff] }
 0xc5e   :  { %1843 = vmatpush.msrb.mxu3 %v2017_v46 }
 0xc5f   :  { %v1649_v61 = vmul.f32 %v1647_v60, %v1647_v60 }
 0xc60   :  { %1844 = vmatpush.msrb.mxu3 %v2016_v52 }
 0xc61   :  { %v1653_v62 = vsel %vm138_vm0, %v1649_v61, 0.0 }
 0xc62   :  { %1654 = vadd.xlane.f32.xlu1 %v1653_v62  ;;  %1845 = vmatpush.msrb.mxu3 %v2015_v58 }
 0xc64   :  { %1846 = vmatpush.msrb.mxu3 %v2014_v59 }
 0xccc   :  { %v1652_v7 = vpop.xlane.xlu0 %1651 }
 0xccd   :  { %v1656_v48 = vmul.f32 %v1652_v7, %v2677_v3 }
 0xccf   :  { %v1658_v8 = vadd.f32 1e-05, %v1656_v48 }
 0xcd1   :  { %2187 = vrsqrt.f32 %v1658_v8  ;;  %vm1666_vm2 = vweird.f32 %v1658_v8 }
 0xcd5   :  { %v1655_v9 = vpop.xlane.xlu1 %1654 }
 0xcd6   :  { %v1657_v17 = vmul.f32 %v1655_v9, %v2677_v3 }
 0xcd7   :  { %v2188_v57 = vpop.eup %2187 }
 0xcd8   :  { %v1661_v5 = vmul.f32 %v2188_v57, %v1658_v8  ;;  %v1659_v10 = vadd.f32 1e-05, %v1657_v17  ;;  %vm1667_vm1 = vweird.f32 %v2188_v57 }
 0xcd9   :  { %vm1668_vm9 = vmor %vm1666_vm2, %vm1667_vm1 }
 0xcda   :  { %v1662_v55 = vmul.f32 %v2188_v57, %v1661_v5  ;;  %2189 = vrsqrt.f32 %v1659_v10  ;;  %vm1676_vm10 = vweird.f32 %v1659_v10 }
 0xcdc   :  { %v1663_v11 = vmul.f32 0.5, %v1662_v55 }
 0xcde   :  { %v1664_v13 = vsub.f32 1.5, %v1663_v11 }
 0xce0   :  { %v2190_v24 = vpop.eup %2189  ;;  %v1665_v12 = vmul.f32 %v2188_v57, %v1664_v13 }
 0xce1   :  { %v1671_v16 = vmul.f32 %v2190_v24, %v1659_v10  ;;  %vm1677_vm8 = vweird.f32 %v2190_v24 }
 0xce2   :  { %v1669_v15 = vsel %vm1668_vm9, %v2188_v57, %v1665_v12  ;;  %vm1678_vm11 = vmor %vm1676_vm10, %vm1677_vm8 }
 0xce3   :  { %v1680_v41 = vmul.f32 %v1669_v15, %v1646_v53  ;;  %v1672_v19 = vmul.f32 %v2190_v24, %v1671_v16 }
 0xce5   :  { %v1685_v6 = vmul.f32 %v2099_v14, %v1680_v41  ;;  %v1673_v20 = vmul.f32 0.5, %v1672_v19 }
 0xce7   :  { %v1674_v21 = vsub.f32 1.5, %v1673_v20  ;;  %v2974_v22 = vadd.f32 %v2100_v30, %v1685_v6 }
 0xce9   :  { %v1675_v63 = vmul.f32 %v2190_v24, %v1674_v21  ;;  %2012 = vmatmul.msk.f32.vlgmr.msrb.gmra.mxu1 %vm138_vm0, %v2974_v22 }
 0xceb   :  { %v1679_v45 = vsel %vm1678_vm11, %v2190_v24, %v1675_v63 }
 0xcec   :  { %v1681_v23 = vmul.f32 %v1679_v45, %v1647_v60 }
 0xcee   :  { %v1686_v25 = vmul.f32 %v2099_v14, %v1681_v23 }
 0xcf0   :  { %v2978_v26 = vadd.f32 %v2100_v30, %v1686_v25 }
 0xcf2   :  { %2013 = vmatmul.msk.f32.gmra.mxu1 %vm138_vm0, %v2978_v26 }
 0xd66   :  { %v1725_v28 = vpop.f32.mrf.mxu1 }
 0xd67   :  { %v2985_v29 = vadd.f32 %v2101_v27, %v1725_v28 }
 0xd69   :  { %v2988_v31 = vmul.f32 0.70710677, %v2985_v29  ;;  %v1731_v1 = vmul.f32 0.5, %v2985_v29  ;;  %v2102_v29 = vld [vmem:[%s3060_s9 + $0x1] ss:$0 sm:$0xff] }
 0xd6b   :  { %v1735_v4 = vand.u32 2147483647, %v2988_v31  ;;  %vm1801_vm1 = vcmp.ge.f32.partialorder %v2988_v31, 0.0 }
 0xd6d   :  { %v1737_v34 = vmul.f32 0.3275911, %v1735_v4  ;;  %v1789_v0 = vsub.f32 0.0, %v1735_v4 }
 0xd6f   :  { %v1739_v32 = vadd.f32 1.0, %v1737_v34  ;;  %v1728_v33 = vpop.f32.mrf.mxu1  ;;  %v1791_v9 = vmul.f32 %v1789_v0, %v1735_v4 }
 0xd70   :  { %v2991_v35 = vadd.f32 %v2101_v27, %v1728_v33 }
 0xd71   :  { %2191 = vrcp.f32 %v1739_v32  ;;  %v1752_v51 = vand.u32 2147483648, %v1739_v32  ;;  %v1750_v54 = vand.u32 2147483647, %v1739_v32  ;;  %vm1746_vm13 = vweird.f32 %v1739_v32 }
 0xd72   :  { %v2997_v37 = vmul.f32 0.70710677, %v2991_v35  ;;  %v1793_v13 = vmul.f32 1.442695, %v1791_v9 }
 0xd73   :  { %v1753_v60 = vor.u32 1.1754944e-38, %v1752_v51  ;;  %vm1751_vm3 = vcmp.eq.f32.partialorder %v1750_v54, 8.507059e+37  ;;  %v1732_v51 = vmul.f32 0.5, %v2991_v35 }
 0xd74   :  { %v1736_v39 = vand.u32 2147483647, %v2997_v37  ;;  %vm1802_vm2 = vcmp.ge.f32.partialorder %v2997_v37, 0.0 }
 0xd76   :  { %v1738_v40 = vmul.f32 0.3275911, %v1736_v39  ;;  %v1790_v14 = vsub.f32 0.0, %v1736_v39 }
 0xd77   :  { %v2192_v42 = vpop.eup %2191 }
 0xd78   :  { %v1742_v18 = vmul.f32 %v2192_v42, %v1739_v32  ;;  %v1740_v44 = vadd.f32 1.0, %v1738_v40  ;;  %vm1747_vm12 = vweird.f32 %v2192_v42  ;;  %v1792_v6 = vmul.f32 %v1790_v14, %v1736_v39 }
 0xd79   :  { %vm1748_vm15 = vmor %vm1746_vm13, %vm1747_vm12 }
 0xd7a   :  { %v1743_v47 = vsub.f32 1.0, %v1742_v18  ;;  %2193 = vrcp.f32 %v1740_v44  ;;  %v1767_v8 = vand.u32 2147483648, %v1740_v44  ;;  %v1765_v57 = vand.u32 2147483647, %v1740_v44 }
 0xd7b   :  { %vm1761_vm5 = vweird.f32 %v1740_v44  ;;  %2195 = vpow2.f32 %v1793_v13  ;;  %v1795_v23 = vmul.f32 1.442695, %v1792_v6  ;;  %v2104_v6 = vld [vmem:[#allocation10 + $0x1] ss:$0 sm:$0xff] }
 0xd7c   :  { %v1744_v53 = vmul.f32 %v2192_v42, %v1743_v47  ;;  %v1768_v11 = vor.u32 1.1754944e-38, %v1767_v8  ;;  %vm1766_vm7 = vcmp.eq.f32.partialorder %v1765_v57, 8.507059e+37 }
 0xd7d   :  { %2197 = vpow2.f32 %v1795_v23 }
 0xd7e   :  { %v1745_v50 = vadd.f32 %v2192_v42, %v1744_v53 }
 0xd80   :  { %v2194_v61 = vpop.eup %2193  ;;  %v1749_v62 = vsel %vm1748_vm15, %v2192_v42, %v1745_v50 }
 0xd81   :  { %v1754_v56 = vsel %vm1751_vm3, %v1753_v60, %v1749_v62  ;;  %v1757_v2 = vmul.f32 %v2194_v61, %v1740_v44  ;;  %vm1762_vm4 = vweird.f32 %v2194_v61  ;;  %v2196_v25 = vpop.eup %2195 }
 0xd82   :  { %v1771_v49 = vmul.f32 1.0614054, %v1754_v56  ;;  %vm1763_vm6 = vmor %vm1761_vm5, %vm1762_vm4 }
 0xd83   :  { %v1758_v7 = vsub.f32 1.0, %v1757_v2  ;;  %v2198_v42 = vpop.eup %2197 }
 0xd84   :  { %v1773_v48 = vadd.f32 -1.4531521, %v1771_v49 }
 0xd85   :  { %v1759_v17 = vmul.f32 %v2194_v61, %v1758_v7 }
 0xd86   :  { %v1775_v5 = vmul.f32 %v1773_v48, %v1754_v56 }
 0xd87   :  { %v1760_v10 = vadd.f32 %v2194_v61, %v1759_v17 }
 0xd88   :  { %v1777_v55 = vadd.f32 1.4214138, %v1775_v5 }
 0xd89   :  { %v1764_v24 = vsel %vm1763_vm6, %v2194_v61, %v1760_v10 }
 0xd8a   :  { %v1779_v12 = vmul.f32 %v1777_v55, %v1754_v56  ;;  %v1769_v16 = vsel %vm1766_vm7, %v1768_v11, %v1764_v24 }
 0xd8b   :  { %v1772_v15 = vmul.f32 1.0614054, %v1769_v16 }
 0xd8c   :  { %v1781_v41 = vadd.f32 -0.28449672, %v1779_v12 }
 0xd8d   :  { %v1774_v19 = vadd.f32 -1.4531521, %v1772_v15  ;;  %v2103_v15 = vld [vmem:[%s3063_s12 + $0x1] ss:$0 sm:$0xff]  ;;  %s1920_s12 = sshll.u32 %s2379_s26, 4  ;;  %s1921_s12 = int_to_ptr.vmem [resolvable:$true] %s1920_s12 }
 0xd8e   :  { %v1783_v30 = vmul.f32 %v1781_v41, %v1754_v56 }
 0xd8f   :  { %v1776_v20 = vmul.f32 %v1774_v19, %v1769_v16 }
 0xd90   :  { %v1785_v21 = vadd.f32 0.2548296, %v1783_v30 }
 0xd91   :  { %v1778_v63 = vadd.f32 1.4214138, %v1776_v20 }
 0xd92   :  { %v1787_v45 = vmul.f32 %v1785_v21, %v1754_v56 }
 0xd93   :  { %v1780_v27 = vmul.f32 %v1778_v63, %v1769_v16 }
 0xd94   :  { %v1797_v28 = vmul.f32 %v2196_v25, %v1787_v45 }
 0xd95   :  { %v1782_v4 = vadd.f32 -0.28449672, %v1780_v27 }
 0xd96   :  { %v1799_v34 = vsub.f32 1.0, %v1797_v28 }
 0xd97   :  { %v1784_v32 = vmul.f32 %v1782_v4, %v1769_v16 }
 0xd98   :  { %v1803_v33 = vsub.f32 0.0, %v1799_v34 }
 0xd99   :  { %v1786_v36 = vadd.f32 0.2548296, %v1784_v32 }
 0xd9a   :  { %v1805_v38 = vsel %vm1801_vm1, %v1799_v34, %v1803_v33 }
 0xd9b   :  { %v1807_v39 = vadd.f32 1.0, %v1805_v38  ;;  %v1788_v40 = vmul.f32 %v1786_v36, %v1769_v16 }
 0xd9d   :  { %v1809_v43 = vmul.f32 %v1807_v39, %v1731_v1  ;;  %v1798_v18 = vmul.f32 %v2198_v42, %v1788_v40 }
 0xd9f   :  { %2023 = vmatmul.msk.f32.vlgmr.msrb.gmra.mxu3 %vm934_vm14, %v1809_v43  ;;  %v1800_v44 = vsub.f32 1.0, %v1798_v18 }
 0xda1   :  { %v1804_v46 = vsub.f32 0.0, %v1800_v44 }
 0xda3   :  { %v1806_v47 = vsel %vm1802_vm2, %v1800_v44, %v1804_v46 }
 0xda4   :  { %v1808_v52 = vadd.f32 1.0, %v1806_v47 }
 0xda6   :  { %v1810_v31 = vmul.f32 %v1808_v52, %v1732_v51 }
 0xda8   :  { %2024 = vmatmul.msk.f32.gmra.mxu3 %vm934_vm14, %v1810_v31 }
 0xe22   :  { %v1848_v53 = vpop.f32.mrf.mxu3 }
 0xe23   :  { %v1849_v54 = vadd.f32 %v2102_v29, %v1848_v53 }
 0xe25   :  { %v1854_v58 = vadd.f32 %v1849_v54, %v2974_v22 }
 0xe27   :  { %v1860_v59 = vsel %vm138_vm0, %v1854_v58, 0.0 }
 0xe28   :  { %1861 = vadd.xlane.f32.xlu2 %v1860_v59 }
 0xe2b   :  { %v1851_v50 = vpop.f32.mrf.mxu3 }
 0xe2c   :  { %v1852_v37 = vadd.f32 %v2102_v29, %v1851_v50 }
 0xe2e   :  { %v1855_v60 = vadd.f32 %v1852_v37, %v2978_v26 }
 0xe30   :  { %v1863_v35 = vsel %vm138_vm0, %v1855_v60, 0.0 }
 0xe31   :  { %1864 = vadd.xlane.f32.xlu0 %v1863_v35 }
 0xe9b   :  { %v1862_v61 = vpop.xlane.xlu2 %1861 }
 0xe9c   :  { %v1866_v62 = vmul.f32 %v1862_v61, %v2677_v3 }
 0xe9e   :  { %v1868_v56 = vsub.f32 %v1854_v58, %v1866_v62 }
 0xea0   :  { %v1870_v0 = vmul.f32 %v1868_v56, %v1868_v56 }
 0xea2   :  { %v1872_v2 = vsel %vm138_vm0, %v1870_v0, 0.0 }
 0xea3   :  { %1873 = vadd.xlane.f32.xlu1 %v1872_v2 }
 0xea4   :  { %v1865_v49 = vpop.xlane.xlu0 %1864 }
 0xea5   :  { %v1867_v22 = vmul.f32 %v1865_v49, %v2677_v3 }
 0xea7   :  { %v1869_v7 = vsub.f32 %v1855_v60, %v1867_v22 }
 0xea9   :  { %v1871_v48 = vmul.f32 %v1869_v7, %v1869_v7 }
 0xeab   :  { %v1875_v8 = vsel %vm138_vm0, %v1871_v48, 0.0 }
 0xeac   :  { %1876 = vadd.xlane.f32.xlu2 %v1875_v8 }
 0xf16   :  { %v1874_v26 = vpop.xlane.xlu1 %1873 }
 0xf17   :  { %v1878_v9 = vmul.f32 %v1874_v26, %v2677_v3 }
 0xf19   :  { %v1880_v17 = vadd.f32 1e-05, %v1878_v9 }
 0xf1b   :  { %2199 = vrsqrt.f32 %v1880_v17  ;;  %vm1888_vm9 = vweird.f32 %v1880_v17 }
 0xf1f   :  { %v1877_v57 = vpop.xlane.xlu2 %1876 }
 0xf20   :  { %v1879_v5 = vmul.f32 %v1877_v57, %v2677_v3 }
 0xf21   :  { %v2200_v10 = vpop.eup %2199 }
 0xf22   :  { %v1883_v55 = vmul.f32 %v2200_v10, %v1880_v17  ;;  %v1881_v11 = vadd.f32 1e-05, %v1879_v5  ;;  %vm1889_vm14 = vweird.f32 %v2200_v10 }
 0xf23   :  { %vm1890_vm8 = vmor %vm1888_vm9, %vm1889_vm14 }
 0xf24   :  { %v1884_v13 = vmul.f32 %v2200_v10, %v1883_v55  ;;  %2201 = vrsqrt.f32 %v1881_v11  ;;  %vm1898_vm11 = vweird.f32 %v1881_v11 }
 0xf26   :  { %v1885_v24 = vmul.f32 0.5, %v1884_v13 }
 0xf28   :  { %v1886_v12 = vsub.f32 1.5, %v1885_v24 }
 0xf2a   :  { %v2202_v14 = vpop.eup %2201  ;;  %v1887_v16 = vmul.f32 %v2200_v10, %v1886_v12 }
 0xf2b   :  { %v1893_v41 = vmul.f32 %v2202_v14, %v1881_v11  ;;  %vm1899_vm10 = vweird.f32 %v2202_v14 }
 0xf2c   :  { %v1891_v19 = vsel %vm1890_vm8, %v2200_v10, %v1887_v16  ;;  %vm1900_vm12 = vmor %vm1898_vm11, %vm1899_vm10 }
 0xf2d   :  { %v1902_v30 = vmul.f32 %v1891_v19, %v1868_v56  ;;  %v1894_v3 = vmul.f32 %v2202_v14, %v1893_v41 }
 0xf2f   :  { %v1907_v20 = vmul.f32 %v2103_v15, %v1902_v30  ;;  %v1895_v21 = vmul.f32 0.5, %v1894_v3 }
 0xf31   :  { %v1896_v63 = vsub.f32 1.5, %v1895_v21  ;;  %v1912_v45 = vadd.f32 %v2104_v6, %v1907_v20 }
 0xf33   :  { %v1897_v23 = vmul.f32 %v2202_v14, %v1896_v63  ;;  %1914 = vst.msk [vmem:[#allocation11] sm:$0xff] %vm138_vm0, %v1912_v45 }
 0xf35   :  { %v1901_v25 = vsel %vm1900_vm12, %v2202_v14, %v1897_v23 }
 0xf36   :  { %v1903_v27 = vmul.f32 %v1901_v25, %v1869_v7 }
 0xf38   :  { %v1908_v28 = vmul.f32 %v2103_v15, %v1903_v27 }
 0xf3a   :  { %v1913_v4 = vadd.f32 %v2104_v6, %v1908_v28 }
 0xf3c   :  { %1915 = vst.msk [vmem:[#allocation11 + $0x8] sm:$0xff] %vm138_vm0, %v1913_v4 }
 0xf3d   :  { %1928 = dma.vmem_to_hbm [thread:$0]  %s1921_s12, 256, %s1923_s29, [#allocation4], %s3074_s6, %s3074_s6, %s2359_s19  }
 0xf3e   :  { %2355 = dma.done.wait [#allocation4], 256  }
 0xf3f   :  { %2356 = vsyncadd [#allocation4], 4294967040 }
 0xf40   :  { %1933 = vsyncpa [#allocation3], 1 }
 0xf41   :  { %1934 = vsyncpa [#allocation6], 1 }
 0xf42   :  { %1935 = vsyncpa [#allocation9], 1 }
 0xf43   :  { %1936 = vsyncpa [#allocation4], 1 }

</bundles_post_ra>
